<compile_context>
chip_gen: v7x
topology: tpu7x:2x2x1
jax: 0.10.0
libtpu: 0.0.40
codegen_flags: <defaults>
</compile_context>

<pallas_src>
import jax
import jax.numpy as jnp
from jax.experimental import pallas as pl
from jax.experimental.pallas import tpu as pltpu

IN_DIM = 28 * 28          # 784 (kept unpadded; Mosaic pads VMEM layout internally)
HID = 512
OUT_DIM = 10
OUT_PAD = 128             # lane-dense output block; sliced back to 10 outside


def _round_up(n, m):
    return ((n + m - 1) // m) * m


def mlp_kernel(x_ref, w1_ref, b1_ref, w2_ref, b2_ref, w3_ref, b3_ref,
               o_ref, h1_ref, h2_ref):
    # x_ref is already bf16 (cast fused into the wrapper) -> bf16 x bf16 MXU matmuls
    # with f32 accumulation. Bias add + ReLU stay in f32; intermediates are staged
    # through explicit bf16 VMEM scratch to keep vreg pressure low.
    h1 = jnp.dot(x_ref[...], w1_ref[...], preferred_element_type=jnp.float32) + b1_ref[...]
    h1_ref[...] = jnp.maximum(h1, 0.0).astype(jnp.bfloat16)
    h2 = jnp.dot(h1_ref[...], w2_ref[...], preferred_element_type=jnp.float32) + b2_ref[...]
    h2_ref[...] = jnp.maximum(h2, 0.0).astype(jnp.bfloat16)
    h3 = jnp.dot(h2_ref[...], w3_ref[...], preferred_element_type=jnp.float32) + b3_ref[...]
    o_ref[...] = jnp.maximum(h3, 0.0).astype(o_ref.dtype)


def neural_network_forward(x, params, *, tile_b=1024):
    """x: (B, 1, 28, 28) float32 NCHW. Returns logits (B, 10) float32."""
    w1, b1, w2, b2, w3, b3 = params
    B = x.shape[0]
    x_flat = x.reshape(B, IN_DIM)                       # nn.Flatten -> (B, 784)

    # Batch tiling:
    #  - small batches: one grid step, rows rounded to 16 (bf16 sublane packing).
    #  - large batches: tiles up to `tile_b` (multiple of 256), but capped so the grid
    #    has >= 2 steps — the 'parallel' axis is what shards work across v7x's 2 TCs.
    if B >= 512:
        tb = min(tile_b, (_round_up(B, 256) // 2) // 256 * 256)
        tb = max(tb, 256)
        B_pad = _round_up(B, tb)
    else:
        tb = _round_up(max(B, 16), 16)
        B_pad = tb

    # Single fused cast to bf16 (+ batch-only zero pad when needed): halves the streamed
    # x bytes and avoids an extra HBM pass over a padded f32 copy.
    x_bf = x_flat.astype(jnp.bfloat16)
    x_p = x_bf if B_pad == B else jnp.zeros((B_pad, IN_DIM), jnp.bfloat16).at[:B].set(x_bf)

    # Weights cast to bf16 once (halves weight DMA + VMEM); output head padded 10 -> 128
    # with zero weights/bias (mathematically inert, sliced off below).
    w1_b = w1.astype(jnp.bfloat16)
    w2_b = w2.astype(jnp.bfloat16)
    w3_p = jnp.zeros((HID, OUT_PAD), jnp.float32).at[:, :OUT_DIM].set(w3).astype(jnp.bfloat16)
    b3_p = jnp.zeros((1, OUT_PAD), jnp.float32).at[:, :OUT_DIM].set(b3)

    grid = (B_pad // tb,)

    # Constant (grid-invariant) operands: single-buffered — no point double-buffering
    # weights that are DMA'd exactly once; frees VMEM headroom for larger batch tiles.
    const = lambda shape: pl.BlockSpec(shape, lambda i: (0, 0),
                                       pipeline_mode=pl.Buffered(1))

    flops = 2 * B_pad * (IN_DIM * HID + HID * HID + HID * OUT_PAD)
    bytes_accessed = (x_p.size * 2
                      + (w1_b.size + w2_b.size + w3_p.size) * 2
                      + (b1.size + b2.size + b3_p.size) * 4
                      + B_pad * OUT_PAD * 2)

    out_padded = pl.pallas_call(
        mlp_kernel,
        out_shape=jax.ShapeDtypeStruct((B_pad, OUT_PAD), jnp.bfloat16),
        grid=grid,
        in_specs=[
            pl.BlockSpec((tb, IN_DIM), lambda i: (i, 0)),   # x tile (streamed over batch)
            const((IN_DIM, HID)), const((1, HID)),          # layer 1 (VMEM-resident)
            const((HID, HID)), const((1, HID)),             # layer 2 (VMEM-resident)
            const((HID, OUT_PAD)), const((1, OUT_PAD)),     # layer 3 (VMEM-resident)
        ],
        out_specs=pl.BlockSpec((tb, OUT_PAD), lambda i: (i, 0)),
        scratch_shapes=[
            pltpu.VMEM((tb, HID), jnp.bfloat16),            # h1 staging
            pltpu.VMEM((tb, HID), jnp.bfloat16),            # h2 staging
        ],
        compiler_params=pltpu.CompilerParams(
            dimension_semantics=("parallel",)),
        cost_estimate=pl.CostEstimate(
            flops=flops, transcendentals=0, bytes_accessed=bytes_accessed),
    )(x_p, w1_b, b1, w2_b, b2, w3_p, b3_p)

    return out_padded[:B, :OUT_DIM].astype(jnp.float32)


def init_params(key):
    """Deterministic PyTorch-style uniform(-1/sqrt(fan_in), 1/sqrt(fan_in)) init.
    Weights are stored transposed: (in, out)."""
    ks = jax.random.split(key, 6)

    def linear(kw, kb, fan_in, fan_out):
        bound = 1.0 / jnp.sqrt(fan_in)
        w = jax.random.uniform(kw, (fan_in, fan_out), jnp.float32, -bound, bound)
        b = jax.random.uniform(kb, (1, fan_out), jnp.float32, -bound, bound)
        return w, b

    w1, b1 = linear(ks[0], ks[1], IN_DIM, HID)
    w2, b2 = linear(ks[2], ks[3], HID, HID)
    w3, b3 = linear(ks[4], ks[5], HID, OUT_DIM)
    return (w1, b1, w2, b2, w3, b3)


if __name__ == "__main__":
    key = jax.random.PRNGKey(0)
    k_x, k_p = jax.random.split(key)

    B = 8
    x = jax.random.normal(k_x, (B, 1, 28, 28), dtype=jnp.float32)
    params = init_params(k_p)

    out = neural_network_forward(x, params)
    out = jax.block_until_ready(out)

    # Pure-JAX reference of the same math (bf16 matmul operands, f32 accumulate).
    w1, b1, w2, b2, w3, b3 = params
    xf = x.reshape(B, -1)

    def ref_layer(a, w, b):
        y = jnp.dot(a.astype(jnp.bfloat16), w.astype(jnp.bfloat16),
                    preferred_element_type=jnp.float32) + b
        return jnp.maximum(y, 0.0)

    ref = ref_layer(xf, w1, b1)
    ref = ref_layer(ref, w2, b2)
    ref = ref_layer(ref, w3, b3)

    assert out.shape == (B, OUT_DIM)
    assert jnp.allclose(out, ref, atol=2e-2, rtol=2e-2), float(jnp.max(jnp.abs(out - ref)))

    print("KERNEL_OK")
</pallas_src>

<mosaic_0001>
module attributes {stable_mosaic.version = 11 : i64} {
  func.func @mlp_kernel(%arg0: i32, %arg1: memref<16x784xbf16, #tpu.memory_space<vmem>>, %arg2: memref<784x512xbf16, #tpu.memory_space<vmem>>, %arg3: memref<1x512xf32, #tpu.memory_space<vmem>>, %arg4: memref<512x512xbf16, #tpu.memory_space<vmem>>, %arg5: memref<1x512xf32, #tpu.memory_space<vmem>>, %arg6: memref<512x128xbf16, #tpu.memory_space<vmem>>, %arg7: memref<1x128xf32, #tpu.memory_space<vmem>>, %arg8: memref<16x128xbf16, #tpu.memory_space<vmem>>, %arg9: memref<16x512xbf16, #tpu.memory_space<vmem>>, %arg10: memref<16x512xbf16, #tpu.memory_space<vmem>>) attributes {dimension_semantics = [#tpu.dimension_semantics<parallel>], iteration_bounds = array<i64: 1>, scalar_prefetch = 0 : i64, scratch_operands = 2 : i64, tpu.core_type = #tpu.core_type<tc>, window_params = [{transform_indices = @transform_0, window_bounds = array<i64: 16, 784>}, {pipeline_mode = #tpu.pipeline_mode<synchronous>, transform_indices = @transform_1, window_bounds = array<i64: 784, 512>}, {pipeline_mode = #tpu.pipeline_mode<synchronous>, transform_indices = @transform_2, window_bounds = array<i64: 1, 512>}, {pipeline_mode = #tpu.pipeline_mode<synchronous>, transform_indices = @transform_3, window_bounds = array<i64: 512, 512>}, {pipeline_mode = #tpu.pipeline_mode<synchronous>, transform_indices = @transform_4, window_bounds = array<i64: 1, 512>}, {pipeline_mode = #tpu.pipeline_mode<synchronous>, transform_indices = @transform_5, window_bounds = array<i64: 512, 128>}, {pipeline_mode = #tpu.pipeline_mode<synchronous>, transform_indices = @transform_6, window_bounds = array<i64: 1, 128>}, {transform_indices = @transform_7, window_bounds = array<i64: 16, 128>}]} {
    %c0 = arith.constant 0 : index
    %c0_0 = arith.constant 0 : index
    %0 = vector.load %arg1[%c0, %c0_0] : memref<16x784xbf16, #tpu.memory_space<vmem>>, vector<16x784xbf16>
    %c0_1 = arith.constant 0 : index
    %c0_2 = arith.constant 0 : index
    %1 = vector.load %arg2[%c0_1, %c0_2] : memref<784x512xbf16, #tpu.memory_space<vmem>>, vector<784x512xbf16>
    %cst = arith.constant dense<0.000000e+00> : vector<16x512xf32>
    %2 = tpu.matmul %0, %1, %cst {dimension_numbers = #tpu.dot_dimension_numbers<[1], [0], [0], [1], [0, 0, 1, 1], [], []>} : vector<16x784xbf16>, vector<784x512xbf16>, vector<16x512xf32> -> vector<16x512xf32>
    %c0_3 = arith.constant 0 : index
    %c0_4 = arith.constant 0 : index
    %3 = vector.load %arg3[%c0_3, %c0_4] : memref<1x512xf32, #tpu.memory_space<vmem>>, vector<1x512xf32>
    %4 = vector.broadcast %3 : vector<1x512xf32> to vector<16x512xf32>
    %5 = arith.addf %2, %4 : vector<16x512xf32>
    %cst_5 = arith.constant 0.000000e+00 : f32
    %6 = vector.broadcast %cst_5 : f32 to vector<16x512xf32>
    %7 = arith.maximumf %5, %6 : vector<16x512xf32>
    %8 = arith.truncf %7 : vector<16x512xf32> to vector<16x512xbf16>
    %c0_6 = arith.constant 0 : index
    %c0_7 = arith.constant 0 : index
    %9 = vector.load %arg9[%c0_6, %c0_7] : memref<16x512xbf16, #tpu.memory_space<vmem>>, vector<16x512xbf16>
    tpu.vector_store %arg9[%c0_6, %c0_7], %8 {strides = array<i32>} : memref<16x512xbf16, #tpu.memory_space<vmem>>, vector<16x512xbf16>,
    %c0_8 = arith.constant 0 : index
    %c0_9 = arith.constant 0 : index
    %10 = vector.load %arg9[%c0_8, %c0_9] : memref<16x512xbf16, #tpu.memory_space<vmem>>, vector<16x512xbf16>
    %c0_10 = arith.constant 0 : index
    %c0_11 = arith.constant 0 : index
    %11 = vector.load %arg4[%c0_10, %c0_11] : memref<512x512xbf16, #tpu.memory_space<vmem>>, vector<512x512xbf16>
    %cst_12 = arith.constant dense<0.000000e+00> : vector<16x512xf32>
    %12 = tpu.matmul %10, %11, %cst_12 {dimension_numbers = #tpu.dot_dimension_numbers<[1], [0], [0], [1], [0, 0, 1, 1], [], []>} : vector<16x512xbf16>, vector<512x512xbf16>, vector<16x512xf32> -> vector<16x512xf32>
    %c0_13 = arith.constant 0 : index
    %c0_14 = arith.constant 0 : index
    %13 = vector.load %arg5[%c0_13, %c0_14] : memref<1x512xf32, #tpu.memory_space<vmem>>, vector<1x512xf32>
    %14 = vector.broadcast %13 : vector<1x512xf32> to vector<16x512xf32>
    %15 = arith.addf %12, %14 : vector<16x512xf32>
    %cst_15 = arith.constant 0.000000e+00 : f32
    %16 = vector.broadcast %cst_15 : f32 to vector<16x512xf32>
    %17 = arith.maximumf %15, %16 : vector<16x512xf32>
    %18 = arith.truncf %17 : vector<16x512xf32> to vector<16x512xbf16>
    %c0_16 = arith.constant 0 : index
    %c0_17 = arith.constant 0 : index
    %19 = vector.load %arg10[%c0_16, %c0_17] : memref<16x512xbf16, #tpu.memory_space<vmem>>, vector<16x512xbf16>
    tpu.vector_store %arg10[%c0_16, %c0_17], %18 {strides = array<i32>} : memref<16x512xbf16, #tpu.memory_space<vmem>>, vector<16x512xbf16>,
    %c0_18 = arith.constant 0 : index
    %c0_19 = arith.constant 0 : index
    %20 = vector.load %arg10[%c0_18, %c0_19] : memref<16x512xbf16, #tpu.memory_space<vmem>>, vector<16x512xbf16>
    %c0_20 = arith.constant 0 : index
    %c0_21 = arith.constant 0 : index
    %21 = vector.load %arg6[%c0_20, %c0_21] : memref<512x128xbf16, #tpu.memory_space<vmem>>, vector<512x128xbf16>
    %cst_22 = arith.constant dense<0.000000e+00> : vector<16x128xf32>
    %22 = tpu.matmul %20, %21, %cst_22 {dimension_numbers = #tpu.dot_dimension_numbers<[1], [0], [0], [1], [0, 0, 1, 1], [], []>} : vector<16x512xbf16>, vector<512x128xbf16>, vector<16x128xf32> -> vector<16x128xf32>
    %c0_23 = arith.constant 0 : index
    %c0_24 = arith.constant 0 : index
    %23 = vector.load %arg7[%c0_23, %c0_24] : memref<1x128xf32, #tpu.memory_space<vmem>>, vector<1x128xf32>
    %24 = vector.broadcast %23 : vector<1x128xf32> to vector<16x128xf32>
    %25 = arith.addf %22, %24 : vector<16x128xf32>
    %cst_25 = arith.constant 0.000000e+00 : f32
    %26 = vector.broadcast %cst_25 : f32 to vector<16x128xf32>
    %27 = arith.maximumf %25, %26 : vector<16x128xf32>
    %28 = arith.truncf %27 : vector<16x128xf32> to vector<16x128xbf16>
    %c0_26 = arith.constant 0 : index
    %c0_27 = arith.constant 0 : index
    %29 = vector.load %arg8[%c0_26, %c0_27] : memref<16x128xbf16, #tpu.memory_space<vmem>>, vector<16x128xbf16>
    tpu.vector_store %arg8[%c0_26, %c0_27], %28 {strides = array<i32>} : memref<16x128xbf16, #tpu.memory_space<vmem>>, vector<16x128xbf16>,
    return
  }
  func.func @transform_0(%arg0: i32) -> (i32, i32) {
    %c0_i32 = arith.constant 0 : i32
    %c0_i32_0 = arith.constant 0 : i32
    return %arg0, %c0_i32 : i32, i32
  }
  func.func @transform_1(%arg0: i32) -> (i32, i32) {
    %c0_i32 = arith.constant 0 : i32
    %c0_i32_0 = arith.constant 0 : i32
    %c0_i32_1 = arith.constant 0 : i32
    return %c0_i32, %c0_i32_0 : i32, i32
  }
  func.func @transform_2(%arg0: i32) -> (i32, i32) {
    %c0_i32 = arith.constant 0 : i32
    %c0_i32_0 = arith.constant 0 : i32
    %c0_i32_1 = arith.constant 0 : i32
    return %c0_i32, %c0_i32_0 : i32, i32
  }
  func.func @transform_3(%arg0: i32) -> (i32, i32) {
    %c0_i32 = arith.constant 0 : i32
    %c0_i32_0 = arith.constant 0 : i32
    %c0_i32_1 = arith.constant 0 : i32
    return %c0_i32, %c0_i32_0 : i32, i32
  }
  func.func @transform_4(%arg0: i32) -> (i32, i32) {
    %c0_i32 = arith.constant 0 : i32
    %c0_i32_0 = arith.constant 0 : i32
    %c0_i32_1 = arith.constant 0 : i32
    return %c0_i32, %c0_i32_0 : i32, i32
  }
  func.func @transform_5(%arg0: i32) -> (i32, i32) {
    %c0_i32 = arith.constant 0 : i32
    %c0_i32_0 = arith.constant 0 : i32
    %c0_i32_1 = arith.constant 0 : i32
    return %c0_i32, %c0_i32_0 : i32, i32
  }
  func.func @transform_6(%arg0: i32) -> (i32, i32) {
    %c0_i32 = arith.constant 0 : i32
    %c0_i32_0 = arith.constant 0 : i32
    %c0_i32_1 = arith.constant 0 : i32
    return %c0_i32, %c0_i32_0 : i32, i32
  }
  func.func @transform_7(%arg0: i32) -> (i32, i32) {
    %c0_i32 = arith.constant 0 : i32
    %c0_i32_0 = arith.constant 0 : i32
    return %arg0, %c0_i32 : i32, i32
  }
}

</mosaic_0001>

<bundles_post_ra>
// kernel: tpu_custom_call.1
= control target key start
LH: loop header
LB: loop body
LE: loop exit
PB: predicated region body
PF: predicated region fallthrough
CT: control target
= control target key end

     0   :  { %12 = vsyncpa [#allocation5], 0  ;;  %s4341_s0 = inlined_call_operand.hbm [shape: bf16[16,784], index: 0, kind: input, shape index: {}]   ;;  %s4342_s1 = inlined_call_operand.hbm [shape: bf16[784,512], index: 1, kind: input, shape index: {}]   ;;  %s4343_s2 = inlined_call_operand.vmem [shape: f32[1,512], index: 2, kind: input, shape index: {}]   ;;  %s4344_s3 = inlined_call_operand.hbm [shape: bf16[512,512], index: 3, kind: input, shape index: {}]   ;;  %s4345_s4 = inlined_call_operand.vmem [shape: f32[1,512], index: 4, kind: input, shape index: {}]   ;;  %s4346_s5 = inlined_call_operand.hbm [shape: bf16[512,128], index: 5, kind: input, shape index: {}]   ;;  %s4347_s6 = inlined_call_operand.vmem [shape: f32[1,128], index: 6, kind: input, shape index: {}]   ;;  %s4348_s7 = inlined_call_operand.hbm [shape: bf16[16,128], index: 7, kind: output, shape index: {}]  }
   0x1   :  { %13 = vsyncpa [#allocation8], 0 }
   0x2   :  { %14 = vsyncpa [#allocation11], 0 }
   0x3   :  { %15 = vsyncpa [#allocation6], 0  ;;  %s4175_s24 = smov [#allocation7]   ;;  %s4057_s28 = scalar_lea.hbm %s4342_s1, 25088 }
   0x4   :  { %s33_s25 = sshll.u32 %s4175_s24, 4  ;;  %p4058_p0 = scmp.ne.s32.totalorder %s4342_s1, %s4057_s28  ;;  %s34_s25 = int_to_ptr.vmem [resolvable:$true] %s33_s25 }
   0x5   :  { %p4061_p1 = scmp.lt.u32.totalorder %s4057_s28, %s4342_s1 }
   0x7   :  { %p4063_p2 = pnand %p4061_p1, %p4058_p0 }
   0x9   :  { %4066 = shalt.err (!%p4063_p2)
}
   0xa   :  { %s4067_s10 = scalar_lea.vmem %s34_s25, 25088  ;;  %p4072_p4 = scmp.lt.s32.totalorder %s34_s25, %s34_s25 }
   0xb   :  { %p4068_p3 = scmp.ne.s32.totalorder %s34_s25, %s4067_s10  ;;  %p4073_p5 = scmp.lt.s32.totalorder %s4067_s10, %s4067_s10 }
   0xd   :  { %p4074_p6 = por %p4073_p5, %p4072_p4 }
   0xf   :  { %p4075_p7 = pnand %p4074_p6, %p4068_p3 }
  0x11   :  { %4078 = shalt.err (!%p4075_p7)
}
  0x12   :  { %s4176_s11 = smov 256   ;;  %s4177_s12 = smov 16  }
  0x13   :  { %39 = dma.hbm_to_vmem [thread:$0]  %s4342_s1, 25088, %s34_s25, [#allocation8], %s4176_s11, %s4176_s11, %s4177_s12  }
  0x14   :  { %s4178_s15 = smov [#allocation4]   ;;  %s4079_s19 = scalar_lea.hbm %s4341_s0, 896 }
  0x15   :  { %s21_s16 = sshll.u32 %s4178_s15, 4  ;;  %p4080_p8 = scmp.ne.s32.totalorder %s4341_s0, %s4079_s19  ;;  %s22_s16 = int_to_ptr.vmem [resolvable:$true] %s21_s16 }
  0x16   :  { %p4083_p9 = scmp.lt.u32.totalorder %s4079_s19, %s4341_s0 }
  0x18   :  { %p4085_p10 = pnand %p4083_p9, %p4080_p8 }
  0x1a   :  { %4088 = shalt.err (!%p4085_p10)
}
  0x1b   :  { %s4089_s24 = scalar_lea.vmem %s22_s16, 896  ;;  %p4094_p12 = scmp.lt.s32.totalorder %s22_s16, %s22_s16 }
  0x1c   :  { %p4090_p11 = scmp.ne.s32.totalorder %s22_s16, %s4089_s24  ;;  %p4095_p13 = scmp.lt.s32.totalorder %s4089_s24, %s4089_s24 }
  0x1e   :  { %p4096_p0 = por %p4095_p13, %p4094_p12 }
  0x20   :  { %p4097_p1 = pnand %p4096_p0, %p4090_p11 }
  0x22   :  { %4100 = shalt.err (!%p4097_p1)
}
  0x23   :  { %s4179_s1 = smov 448   ;;  %s4180_s25 = smov 28  }
  0x24   :  { %27 = dma.hbm_to_vmem [thread:$0]  %s4341_s0, 896, %s22_s16, [#allocation5], %s4179_s1, %s4179_s1, %s4180_s25  }
  0x25   :  { %s4181_s28 = smov [#allocation9]   ;;  %s4182_s30 = smov [#allocation10]  }
  0x26   :  { %s47_s29 = sshll.u32 %s4181_s28, 4  ;;  %s61_s8 = sshll.u32 %s4182_s30, 4  ;;  %s48_s29 = int_to_ptr.vmem [resolvable:$true] %s47_s29  ;;  %s4254_s8 = int_to_ptr.vmem [resolvable:$true] %s61_s8 }
  0x27   :  { %s4101_s13 = scalar_lea.hbm %s4344_s3, 16384 }
  0x28   :  { %p4102_p2 = scmp.ne.s32.totalorder %s4344_s3, %s4101_s13  ;;  %p4105_p3 = scmp.lt.u32.totalorder %s4101_s13, %s4344_s3 }
  0x2a   :  { %p4107_p4 = pnand %p4105_p3, %p4102_p2 }
  0x2c   :  { %4110 = shalt.err (!%p4107_p4)
}
  0x2d   :  { %s4111_s0 = scalar_lea.vmem %s48_s29, 16384  ;;  %p4116_p6 = scmp.lt.s32.totalorder %s48_s29, %s48_s29 }
  0x2e   :  { %p4112_p5 = scmp.ne.s32.totalorder %s48_s29, %s4111_s0  ;;  %p4117_p7 = scmp.lt.s32.totalorder %s4111_s0, %s4111_s0 }
  0x30   :  { %p4118_p8 = por %p4117_p7, %p4116_p6 }
  0x32   :  { %p4119_p9 = pnand %p4118_p8, %p4112_p5 }
  0x34   :  { %4122 = shalt.err (!%p4119_p9)
}
  0x35   :  { %53 = dma.hbm_to_vmem [thread:$0]  %s4344_s3, 16384, %s48_s29, [#allocation8], %s4176_s11, %s4176_s11, %s4177_s12  }
  0x36   :  { %s4123_s22 = scalar_lea.hbm %s4346_s5, 4096 }
  0x37   :  { %p4124_p10 = scmp.ne.s32.totalorder %s4346_s5, %s4123_s22  ;;  %p4127_p11 = scmp.lt.u32.totalorder %s4123_s22, %s4346_s5 }
  0x39   :  { %p4129_p12 = pnand %p4127_p11, %p4124_p10 }
  0x3b   :  { %4132 = shalt.err (!%p4129_p12)
}
  0x3c   :  { %s4133_s26 = scalar_lea.vmem %s4254_s8, 4096  ;;  %p4138_p0 = scmp.lt.s32.totalorder %s4254_s8, %s4254_s8 }
  0x3d   :  { %p4134_p13 = scmp.ne.s32.totalorder %s4254_s8, %s4133_s26  ;;  %p4139_p1 = scmp.lt.s32.totalorder %s4133_s26, %s4133_s26 }
  0x3f   :  { %p4140_p2 = por %p4139_p1, %p4138_p0 }
  0x41   :  { %p4141_p3 = pnand %p4140_p2, %p4134_p13 }
  0x43   :  { %4144 = shalt.err (!%p4141_p3)
}
  0x44   :  { %s4183_s3 = smov 64   ;;  %s4184_s11 = smov 4  }
  0x45   :  { %67 = dma.hbm_to_vmem [thread:$0]  %s4346_s5, 4096, %s4254_s8, [#allocation11], %s4183_s3, %s4183_s3, %s4184_s11  }
  0x46   :  { %4167 = dma.done.wait [#allocation5], 896  }
  0x47   :  { %4168 = vsyncadd [#allocation5], 4294966400 }
  0x48   :  { %4169 = dma.done.wait [#allocation8], 41472  }
  0x49   :  { %4170 = vsyncadd [#allocation8], 4294925824 }
  0x4a   :  { %4171 = dma.done.wait [#allocation11], 4096  }
  0x4b   :  { %4172 = vsyncadd [#allocation11], 4294963200  ;;  %v3529_v0 = vld [vmem:[#allocation7 + $0x4] ss:$16 sps:$4 sm:$0xff]   ;;  %v3531_v1 = vld [vmem:[#allocation7 + $0xc] ss:$16 sps:$4 sm:$0xff]  }
  0x4c   :  { %1328 = vmatprep.subr.bf16.mxu0 %v3529_v0  ;;  %v3533_v2 = vld [vmem:[#allocation7] ss:$16 sps:$4 sm:$0xff]   ;;  %v3534_v3 = vld [vmem:[#allocation7 + $0x8] ss:$16 sps:$4 sm:$0xff]   ;;  %1500 = vmatprep.subr.bf16.mxu1 %v3531_v1  ;;  %v3535_v4 = vld [vmem:[#allocation7 + $0x24] ss:$16 sps:$4 sm:$0xff]  }
  0x4d   :  { %1329 = vmatpush1.bf16.msra.mxu0 %v3533_v2  ;;  %1501 = vmatpush1.bf16.msra.mxu1 %v3534_v3  ;;  %v3537_v5 = vld [vmem:[#allocation7 + $0x2c] ss:$16 sps:$4 sm:$0xff]   ;;  %v3539_v6 = vld [vmem:[#allocation7 + $0x20] ss:$16 sps:$4 sm:$0xff]   ;;  %v3540_v7 = vld [vmem:[#allocation7 + $0x28] ss:$16 sps:$4 sm:$0xff]  }
  0x4e   :  { %1330 = vmatprep.subr.bf16.mxu0 %v3535_v4  ;;  %1502 = vmatprep.subr.bf16.mxu1 %v3537_v5  ;;  %v3541_v8 = vld [vmem:[#allocation7 + $0x44] ss:$16 sps:$4 sm:$0xff]   ;;  %v3543_v9 = vld [vmem:[#allocation7 + $0x4c] ss:$16 sps:$4 sm:$0xff]   ;;  %v3545_v10 = vld [vmem:[#allocation7 + $0x40] ss:$16 sps:$4 sm:$0xff]  }
  0x4f   :  { %v3546_v11 = vld [vmem:[#allocation7 + $0x48] ss:$16 sps:$4 sm:$0xff]   ;;  %v3547_v12 = vld [vmem:[#allocation7 + $0x64] ss:$16 sps:$4 sm:$0xff]   ;;  %v3549_v13 = vld [vmem:[#allocation7 + $0x6c] ss:$16 sps:$4 sm:$0xff]  }
  0x50   :  { %v3551_v14 = vld [vmem:[#allocation7 + $0x60] ss:$16 sps:$4 sm:$0xff]   ;;  %v3552_v15 = vld [vmem:[#allocation7 + $0x68] ss:$16 sps:$4 sm:$0xff]   ;;  %v3553_v16 = vld [vmem:[#allocation7 + $0x84] ss:$16 sps:$4 sm:$0xff]  }
  0x51   :  { %1331 = vmatpush1.bf16.msra.mxu0 %v3539_v6  ;;  %1503 = vmatpush1.bf16.msra.mxu1 %v3540_v7  ;;  %v3555_v17 = vld [vmem:[#allocation7 + $0x8c] ss:$16 sps:$4 sm:$0xff]   ;;  %v3557_v18 = vld [vmem:[#allocation7 + $0x80] ss:$16 sps:$4 sm:$0xff]   ;;  %v3558_v19 = vld [vmem:[#allocation7 + $0x88] ss:$16 sps:$4 sm:$0xff]  }
  0x52   :  { %1332 = vmatprep.subr.bf16.mxu0 %v3541_v8  ;;  %1504 = vmatprep.subr.bf16.mxu1 %v3543_v9  ;;  %v3559_v20 = vld [vmem:[#allocation7 + $0xa4] ss:$16 sps:$4 sm:$0xff]   ;;  %v3561_v21 = vld [vmem:[#allocation7 + $0xac] ss:$16 sps:$4 sm:$0xff]   ;;  %v3563_v22 = vld [vmem:[#allocation7 + $0xa0] ss:$16 sps:$4 sm:$0xff]  }
  0x53   :  { %v3564_v23 = vld [vmem:[#allocation7 + $0xa8] ss:$16 sps:$4 sm:$0xff]   ;;  %v3565_v24 = vld [vmem:[#allocation7 + $0xc4] ss:$16 sps:$4 sm:$0xff]   ;;  %v3567_v25 = vld [vmem:[#allocation7 + $0xcc] ss:$16 sps:$4 sm:$0xff]  }
  0x54   :  { %v3569_v26 = vld [vmem:[#allocation7 + $0xc0] ss:$16 sps:$4 sm:$0xff]   ;;  %v3570_v27 = vld [vmem:[#allocation7 + $0xc8] ss:$16 sps:$4 sm:$0xff]   ;;  %v3571_v28 = vld [vmem:[#allocation7 + $0xe4] ss:$16 sps:$4 sm:$0xff]  }
  0x55   :  { %1333 = vmatpush1.bf16.msra.mxu0 %v3545_v10  ;;  %1505 = vmatpush1.bf16.msra.mxu1 %v3546_v11  ;;  %v3573_v29 = vld [vmem:[#allocation7 + $0xec] ss:$16 sps:$4 sm:$0xff]   ;;  %v3575_v30 = vld [vmem:[#allocation7 + $0xe0] ss:$16 sps:$4 sm:$0xff]   ;;  %v3576_v31 = vld [vmem:[#allocation7 + $0xe8] ss:$16 sps:$4 sm:$0xff]  }
  0x56   :  { %1334 = vmatprep.subr.bf16.mxu0 %v3547_v12  ;;  %1506 = vmatprep.subr.bf16.mxu1 %v3549_v13  ;;  %v3577_v32 = vld [vmem:[#allocation7 + $0x104] ss:$16 sps:$4 sm:$0xff]   ;;  %v3579_v33 = vld [vmem:[#allocation7 + $0x10c] ss:$16 sps:$4 sm:$0xff]   ;;  %v3581_v34 = vld [vmem:[#allocation7 + $0x100] ss:$16 sps:$4 sm:$0xff]  }
  0x57   :  { %v3582_v35 = vld [vmem:[#allocation7 + $0x108] ss:$16 sps:$4 sm:$0xff]   ;;  %v3583_v36 = vld [vmem:[#allocation7 + $0x124] ss:$16 sps:$4 sm:$0xff]   ;;  %v3585_v37 = vld [vmem:[#allocation7 + $0x12c] ss:$16 sps:$4 sm:$0xff]  }
  0x58   :  { %v3587_v38 = vld [vmem:[#allocation7 + $0x120] ss:$16 sps:$4 sm:$0xff]   ;;  %v3588_v39 = vld [vmem:[#allocation7 + $0x128] ss:$16 sps:$4 sm:$0xff]   ;;  %v3589_v40 = vld [vmem:[#allocation7 + $0x144] ss:$16 sps:$4 sm:$0xff]  }
  0x59   :  { %1335 = vmatpush1.bf16.msra.mxu0 %v3551_v14  ;;  %1507 = vmatpush1.bf16.msra.mxu1 %v3552_v15  ;;  %v3591_v41 = vld [vmem:[#allocation7 + $0x14c] ss:$16 sps:$4 sm:$0xff]   ;;  %v3593_v42 = vld [vmem:[#allocation7 + $0x140] ss:$16 sps:$4 sm:$0xff]   ;;  %v3594_v43 = vld [vmem:[#allocation7 + $0x148] ss:$16 sps:$4 sm:$0xff]  }
  0x5a   :  { %1336 = vmatprep.subr.bf16.mxu0 %v3553_v16  ;;  %1508 = vmatprep.subr.bf16.mxu1 %v3555_v17  ;;  %v3595_v44 = vld [vmem:[#allocation7 + $0x164] ss:$16 sps:$4 sm:$0xff]   ;;  %v3597_v45 = vld [vmem:[#allocation7 + $0x16c] ss:$16 sps:$4 sm:$0xff]   ;;  %v3599_v46 = vld [vmem:[#allocation7 + $0x160] ss:$16 sps:$4 sm:$0xff]  }
  0x5b   :  { %v3600_v47 = vld [vmem:[#allocation7 + $0x168] ss:$16 sps:$4 sm:$0xff]   ;;  %v3601_v49 = vld [vmem:[#allocation7 + $0x184] ss:$16 sps:$4 sm:$0xff]   ;;  %v3603_v50 = vld [vmem:[#allocation7 + $0x18c] ss:$16 sps:$4 sm:$0xff]  }
  0x5c   :  { %v3627_v48 = vld [vmem:[#allocation4 + $0x4] ss:$28 sps:$4 sm:$0xff]   ;;  %v3605_v51 = vld [vmem:[#allocation7 + $0x180] ss:$16 sps:$4 sm:$0xff]   ;;  %v3607_v53 = vld [vmem:[#allocation7 + $0x1a4] ss:$16 sps:$4 sm:$0xff]  }
  0x5d   :  { %1337 = vmatpush1.bf16.msra.mxu0 %v3557_v18  ;;  %1509 = vmatpush1.bf16.msra.mxu1 %v3558_v19  ;;  %v3606_v52 = vld [vmem:[#allocation7 + $0x188] ss:$16 sps:$4 sm:$0xff]   ;;  %v3609_v54 = vld [vmem:[#allocation7 + $0x1ac] ss:$16 sps:$4 sm:$0xff]   ;;  %v3611_v55 = vld [vmem:[#allocation7 + $0x1a0] ss:$16 sps:$4 sm:$0xff]  }
  0x5e   :  { %1338 = vmatprep.subr.bf16.mxu0 %v3559_v20  ;;  %1510 = vmatprep.subr.bf16.mxu1 %v3561_v21  ;;  %v3612_v56 = vld [vmem:[#allocation7 + $0x1a8] ss:$16 sps:$4 sm:$0xff]   ;;  %v3613_v57 = vld [vmem:[#allocation7 + $0x1c4] ss:$16 sps:$4 sm:$0xff]   ;;  %v3615_v58 = vld [vmem:[#allocation7 + $0x1cc] ss:$16 sps:$4 sm:$0xff]  }
  0x5f   :  { %1360 = vmatprep.mubr.bf16.mxu0 %v3627_v48  ;;  %1532 = vmatprep.mubr.bf16.mxu1 %v3627_v48  ;;  %v3617_v59 = vld [vmem:[#allocation7 + $0x1c0] ss:$16 sps:$4 sm:$0xff]   ;;  %v3618_v60 = vld [vmem:[#allocation7 + $0x1c8] ss:$16 sps:$4 sm:$0xff]   ;;  %v3619_v61 = vld [vmem:[#allocation7 + $0x1e4] ss:$16 sps:$4 sm:$0xff]  }
  0x60   :  { %v3621_v62 = vld [vmem:[#allocation7 + $0x1ec] ss:$16 sps:$4 sm:$0xff]   ;;  %v3623_v63 = vld [vmem:[#allocation7 + $0x1e0] ss:$16 sps:$4 sm:$0xff]   ;;  %v3624_v0 = vld [vmem:[#allocation7 + $0x1e8] ss:$16 sps:$4 sm:$0xff]  }
  0x61   :  { %1339 = vmatpush1.bf16.msra.mxu0 %v3563_v22  ;;  %1511 = vmatpush1.bf16.msra.mxu1 %v3564_v23  ;;  %v3630_v1 = vld [vmem:[#allocation7 + $0x204] ss:$16 sps:$4 sm:$0xff]   ;;  %v3633_v2 = vld [vmem:[#allocation7 + $0x20c] ss:$16 sps:$4 sm:$0xff]   ;;  %v3628_v4 = vld [vmem:[#allocation7 + $0x200] ss:$16 sps:$4 sm:$0xff]  }
  0x62   :  { %1340 = vmatprep.subr.bf16.mxu0 %v3565_v24  ;;  %1512 = vmatprep.subr.bf16.mxu1 %v3567_v25  ;;  %v3625_v3 = vld [vmem:[#allocation4] ss:$28 sps:$4 sm:$0xff]   ;;  %v3639_v7 = vld [vmem:[#allocation7 + $0x22c] ss:$16 sps:$4 sm:$0xff]   ;;  %v3634_v8 = vld [vmem:[#allocation7 + $0x220] ss:$16 sps:$4 sm:$0xff]  }
  0x63   :  { %v3631_v5 = vld [vmem:[#allocation7 + $0x208] ss:$16 sps:$4 sm:$0xff]   ;;  %v3636_v6 = vld [vmem:[#allocation7 + $0x224] ss:$16 sps:$4 sm:$0xff]   ;;  %v3645_v11 = vld [vmem:[#allocation7 + $0x24c] ss:$16 sps:$4 sm:$0xff]  }
  0x64   :  { %v3637_v9 = vld [vmem:[#allocation7 + $0x228] ss:$16 sps:$4 sm:$0xff]   ;;  %v3642_v10 = vld [vmem:[#allocation7 + $0x244] ss:$16 sps:$4 sm:$0xff]   ;;  %v3640_v12 = vld [vmem:[#allocation7 + $0x240] ss:$16 sps:$4 sm:$0xff]  }
  0x65   :  { %1341 = vmatpush1.bf16.msra.mxu0 %v3569_v26  ;;  %1513 = vmatpush1.bf16.msra.mxu1 %v3570_v27  ;;  %v3643_v13 = vld [vmem:[#allocation7 + $0x248] ss:$16 sps:$4 sm:$0xff]   ;;  %v3648_v14 = vld [vmem:[#allocation7 + $0x264] ss:$16 sps:$4 sm:$0xff]   ;;  %v3651_v15 = vld [vmem:[#allocation7 + $0x26c] ss:$16 sps:$4 sm:$0xff]  }
  0x66   :  { %1342 = vmatprep.subr.bf16.mxu0 %v3571_v28  ;;  %1514 = vmatprep.subr.bf16.mxu1 %v3573_v29  ;;  %v3646_v16 = vld [vmem:[#allocation7 + $0x260] ss:$16 sps:$4 sm:$0xff]   ;;  %v3649_v17 = vld [vmem:[#allocation7 + $0x268] ss:$16 sps:$4 sm:$0xff]   ;;  %v3654_v18 = vld [vmem:[#allocation7 + $0x284] ss:$16 sps:$4 sm:$0xff]  }
  0x67   :  { %v3657_v19 = vld [vmem:[#allocation7 + $0x28c] ss:$16 sps:$4 sm:$0xff]   ;;  %v3652_v20 = vld [vmem:[#allocation7 + $0x280] ss:$16 sps:$4 sm:$0xff]   ;;  %v3655_v21 = vld [vmem:[#allocation7 + $0x288] ss:$16 sps:$4 sm:$0xff]  }
  0x68   :  { %v3660_v22 = vld [vmem:[#allocation7 + $0x2a4] ss:$16 sps:$4 sm:$0xff]   ;;  %v3663_v23 = vld [vmem:[#allocation7 + $0x2ac] ss:$16 sps:$4 sm:$0xff]   ;;  %v3658_v24 = vld [vmem:[#allocation7 + $0x2a0] ss:$16 sps:$4 sm:$0xff]  }
  0x69   :  { %1343 = vmatpush1.bf16.msra.mxu0 %v3575_v30  ;;  %1515 = vmatpush1.bf16.msra.mxu1 %v3576_v31  ;;  %v3661_v25 = vld [vmem:[#allocation7 + $0x2a8] ss:$16 sps:$4 sm:$0xff]   ;;  %v3666_v26 = vld [vmem:[#allocation7 + $0x2c4] ss:$16 sps:$4 sm:$0xff]   ;;  %v3669_v27 = vld [vmem:[#allocation7 + $0x2cc] ss:$16 sps:$4 sm:$0xff]  }
  0x6a   :  { %1344 = vmatprep.subr.bf16.mxu0 %v3577_v32  ;;  %1516 = vmatprep.subr.bf16.mxu1 %v3579_v33  ;;  %v3664_v28 = vld [vmem:[#allocation7 + $0x2c0] ss:$16 sps:$4 sm:$0xff]   ;;  %v3667_v29 = vld [vmem:[#allocation7 + $0x2c8] ss:$16 sps:$4 sm:$0xff]   ;;  %v3672_v31 = vld [vmem:[#allocation7 + $0x2e4] ss:$16 sps:$4 sm:$0xff]  }
  0x6b   :  { %v3726_v30 = vld [vmem:[#allocation4 + $0xc] ss:$28 sps:$4 sm:$0xff]   ;;  %v3675_v32 = vld [vmem:[#allocation7 + $0x2ec] ss:$16 sps:$4 sm:$0xff]   ;;  %vm1324_vm0 = vcmask 130048   ;;  %s4186_s8 = smov [#allocation12]  }
  0x6c   :  { %v3670_v33 = vld [vmem:[#allocation7 + $0x2e0] ss:$16 sps:$4 sm:$0xff]   ;;  %v3699_v48 = vld [vmem:[#allocation7 + $0x36c] ss:$16 sps:$4 sm:$0xff]   ;;  %s3036_s9 = sshll.u32 %s4186_s8, 4  ;;  %s3037_s9 = int_to_ptr.vmem [resolvable:$true] %s3036_s9 }
  0x6d   :  { %1345 = vmatpush1.bf16.msra.mxu0 %v3581_v34  ;;  %1517 = vmatpush1.bf16.msra.mxu1 %v3582_v35  ;;  %v3673_v34 = vld [vmem:[#allocation7 + $0x2e8] ss:$16 sps:$4 sm:$0xff]   ;;  %v3678_v35 = vld [vmem:[#allocation7 + $0x304] ss:$16 sps:$4 sm:$0xff]   ;;  %p4150_p5 = scmp.lt.s32.totalorder %s3037_s9, %s3037_s9 }
  0x6e   :  { %1346 = vmatprep.subr.bf16.mxu0 %v3583_v36  ;;  %1518 = vmatprep.subr.bf16.mxu1 %v3585_v37  ;;  %v3681_v36 = vld [vmem:[#allocation7 + $0x30c] ss:$16 sps:$4 sm:$0xff]   ;;  %v3676_v37 = vld [vmem:[#allocation7 + $0x300] ss:$16 sps:$4 sm:$0xff]  }
  0x71   :  { %1347 = vmatpush1.bf16.msra.mxu0 %v3587_v38  ;;  %1519 = vmatpush1.bf16.msra.mxu1 %v3588_v39  ;;  %v3679_v38 = vld [vmem:[#allocation7 + $0x308] ss:$16 sps:$4 sm:$0xff]   ;;  %v3684_v39 = vld [vmem:[#allocation7 + $0x324] ss:$16 sps:$4 sm:$0xff]  }
  0x72   :  { %1348 = vmatprep.subr.bf16.mxu0 %v3589_v40  ;;  %1520 = vmatprep.subr.bf16.mxu1 %v3591_v41  ;;  %v3687_v40 = vld [vmem:[#allocation7 + $0x32c] ss:$16 sps:$4 sm:$0xff]   ;;  %v3682_v41 = vld [vmem:[#allocation7 + $0x320] ss:$16 sps:$4 sm:$0xff]  }
  0x75   :  { %1349 = vmatpush1.bf16.msra.mxu0 %v3593_v42  ;;  %1521 = vmatpush1.bf16.msra.mxu1 %v3594_v43  ;;  %v3685_v42 = vld [vmem:[#allocation7 + $0x328] ss:$16 sps:$4 sm:$0xff]   ;;  %v3690_v43 = vld [vmem:[#allocation7 + $0x344] ss:$16 sps:$4 sm:$0xff]  }
  0x76   :  { %1350 = vmatprep.subr.bf16.mxu0 %v3595_v44  ;;  %1522 = vmatprep.subr.bf16.mxu1 %v3597_v45  ;;  %v3693_v44 = vld [vmem:[#allocation7 + $0x34c] ss:$16 sps:$4 sm:$0xff]   ;;  %v3688_v45 = vld [vmem:[#allocation7 + $0x340] ss:$16 sps:$4 sm:$0xff]  }
  0x79   :  { %1351 = vmatpush1.bf16.msra.mxu0 %v3599_v46  ;;  %1523 = vmatpush1.bf16.msra.mxu1 %v3600_v47  ;;  %v3691_v46 = vld [vmem:[#allocation7 + $0x348] ss:$16 sps:$4 sm:$0xff]   ;;  %v3696_v47 = vld [vmem:[#allocation7 + $0x364] ss:$16 sps:$4 sm:$0xff]  }
  0x7a   :  { %1352 = vmatprep.subr.bf16.mxu0 %v3601_v49  ;;  %1524 = vmatprep.subr.bf16.mxu1 %v3603_v50  ;;  %v3694_v49 = vld [vmem:[#allocation7 + $0x360] ss:$16 sps:$4 sm:$0xff]   ;;  %v3697_v50 = vld [vmem:[#allocation7 + $0x368] ss:$16 sps:$4 sm:$0xff]  }
  0x7d   :  { %1353 = vmatpush1.bf16.msra.mxu0 %v3605_v51  ;;  %1525 = vmatpush1.bf16.msra.mxu1 %v3606_v52  ;;  %v3702_v51 = vld [vmem:[#allocation7 + $0x384] ss:$16 sps:$4 sm:$0xff]   ;;  %v3705_v52 = vld [vmem:[#allocation7 + $0x38c] ss:$16 sps:$4 sm:$0xff]  }
  0x7e   :  { %1354 = vmatprep.subr.bf16.mxu0 %v3607_v53  ;;  %1526 = vmatprep.subr.bf16.mxu1 %v3609_v54  ;;  %v3700_v53 = vld [vmem:[#allocation7 + $0x380] ss:$16 sps:$4 sm:$0xff]   ;;  %v3703_v54 = vld [vmem:[#allocation7 + $0x388] ss:$16 sps:$4 sm:$0xff]  }
  0x81   :  { %1355 = vmatpush1.bf16.msra.mxu0 %v3611_v55  ;;  %1527 = vmatpush1.bf16.msra.mxu1 %v3612_v56  ;;  %v3708_v55 = vld [vmem:[#allocation7 + $0x3a4] ss:$16 sps:$4 sm:$0xff]   ;;  %v3711_v56 = vld [vmem:[#allocation7 + $0x3ac] ss:$16 sps:$4 sm:$0xff]  }
  0x82   :  { %1356 = vmatprep.subr.bf16.mxu0 %v3613_v57  ;;  %1528 = vmatprep.subr.bf16.mxu1 %v3615_v58  ;;  %v3706_v57 = vld [vmem:[#allocation7 + $0x3a0] ss:$16 sps:$4 sm:$0xff]   ;;  %v3709_v58 = vld [vmem:[#allocation7 + $0x3a8] ss:$16 sps:$4 sm:$0xff]  }
  0x85   :  { %1357 = vmatpush1.bf16.msra.mxu0 %v3617_v59  ;;  %1529 = vmatpush1.bf16.msra.mxu1 %v3618_v60  ;;  %v3714_v59 = vld [vmem:[#allocation7 + $0x3c4] ss:$16 sps:$4 sm:$0xff]   ;;  %v3717_v60 = vld [vmem:[#allocation7 + $0x3cc] ss:$16 sps:$4 sm:$0xff]  }
  0x86   :  { %1358 = vmatprep.subr.bf16.mxu0 %v3619_v61  ;;  %1530 = vmatprep.subr.bf16.mxu1 %v3621_v62  ;;  %v3712_v61 = vld [vmem:[#allocation7 + $0x3c0] ss:$16 sps:$4 sm:$0xff]   ;;  %v3715_v62 = vld [vmem:[#allocation7 + $0x3c8] ss:$16 sps:$4 sm:$0xff]  }
  0x89   :  { %1359 = vmatpush1.bf16.msra.mxu0 %v3623_v63  ;;  %1531 = vmatpush1.bf16.msra.mxu1 %v3624_v0  ;;  %v3720_v63 = vld [vmem:[#allocation7 + $0x3e4] ss:$16 sps:$4 sm:$0xff]   ;;  %v3723_v0 = vld [vmem:[#allocation7 + $0x3ec] ss:$16 sps:$4 sm:$0xff]  }
  0x8a   :  { %1371 = vmatprep.subr.bf16.mxu0 %v3630_v1  ;;  %1543 = vmatprep.subr.bf16.mxu1 %v3633_v2  ;;  %v3718_v1 = vld [vmem:[#allocation7 + $0x3e0] ss:$16 sps:$4 sm:$0xff]   ;;  %v3721_v2 = vld [vmem:[#allocation7 + $0x3e8] ss:$16 sps:$4 sm:$0xff]  }
  0x8c   :  { %1361 = vmatmul.mubr.bf16.vlgmr.msra.gmra.mrb[0].mxu0 %v3625_v3  ;;  %1533 = vmatmul.mubr.bf16.vlgmr.msra.gmra.mrb[0].mxu1 %v3625_v3  ;;  %v3729_v3 = vld [vmem:[#allocation7 + $0x404] ss:$16 sps:$4 sm:$0xff]  }
  0x8d   :  { %1372 = vmatpush1.bf16.msra.mxu0 %v3628_v4  ;;  %1544 = vmatpush1.bf16.msra.mxu1 %v3631_v5  ;;  %v3732_v4 = vld [vmem:[#allocation7 + $0x40c] ss:$16 sps:$4 sm:$0xff]  }
  0x8e   :  { %1373 = vmatprep.subr.bf16.mxu0 %v3636_v6  ;;  %1545 = vmatprep.subr.bf16.mxu1 %v3639_v7  ;;  %v3724_v5 = vld [vmem:[#allocation4 + $0x8] ss:$28 sps:$4 sm:$0xff]   ;;  %v3730_v7 = vld [vmem:[#allocation7 + $0x408] ss:$16 sps:$4 sm:$0xff]  }
  0x8f   :  { %1403 = vmatprep.mubr.bf16.mxu0 %v3726_v30  ;;  %1575 = vmatprep.mubr.bf16.mxu1 %v3726_v30  ;;  %v3727_v6 = vld [vmem:[#allocation7 + $0x400] ss:$16 sps:$4 sm:$0xff]   ;;  %v3768_v30 = vld [vmem:[#allocation7 + $0x4cc] ss:$16 sps:$4 sm:$0xff]  }
  0x91   :  { %1374 = vmatpush1.bf16.msra.mxu0 %v3634_v8  ;;  %1546 = vmatpush1.bf16.msra.mxu1 %v3637_v9  ;;  %v3735_v8 = vld [vmem:[#allocation7 + $0x424] ss:$16 sps:$4 sm:$0xff]   ;;  %v3738_v9 = vld [vmem:[#allocation7 + $0x42c] ss:$16 sps:$4 sm:$0xff]  }
  0x92   :  { %1375 = vmatprep.subr.bf16.mxu0 %v3642_v10  ;;  %1547 = vmatprep.subr.bf16.mxu1 %v3645_v11  ;;  %v3733_v10 = vld [vmem:[#allocation7 + $0x420] ss:$16 sps:$4 sm:$0xff]   ;;  %v3736_v11 = vld [vmem:[#allocation7 + $0x428] ss:$16 sps:$4 sm:$0xff]  }
  0x95   :  { %1376 = vmatpush1.bf16.msra.mxu0 %v3640_v12  ;;  %1548 = vmatpush1.bf16.msra.mxu1 %v3643_v13  ;;  %v3825_v12 = vld [vmem:[#allocation4 + $0x14] ss:$28 sps:$4 sm:$0xff]   ;;  %v3741_v13 = vld [vmem:[#allocation7 + $0x444] ss:$16 sps:$4 sm:$0xff]  }
  0x96   :  { %1377 = vmatprep.subr.bf16.mxu0 %v3648_v14  ;;  %1549 = vmatprep.subr.bf16.mxu1 %v3651_v15  ;;  %v3744_v14 = vld [vmem:[#allocation7 + $0x44c] ss:$16 sps:$4 sm:$0xff]   ;;  %v3739_v15 = vld [vmem:[#allocation7 + $0x440] ss:$16 sps:$4 sm:$0xff]  }
  0x99   :  { %1378 = vmatpush1.bf16.msra.mxu0 %v3646_v16  ;;  %1550 = vmatpush1.bf16.msra.mxu1 %v3649_v17  ;;  %v3742_v16 = vld [vmem:[#allocation7 + $0x448] ss:$16 sps:$4 sm:$0xff]   ;;  %v3747_v17 = vld [vmem:[#allocation7 + $0x464] ss:$16 sps:$4 sm:$0xff]  }
  0x9a   :  { %1379 = vmatprep.subr.bf16.mxu0 %v3654_v18  ;;  %1551 = vmatprep.subr.bf16.mxu1 %v3657_v19  ;;  %v3750_v18 = vld [vmem:[#allocation7 + $0x46c] ss:$16 sps:$4 sm:$0xff]   ;;  %v3745_v19 = vld [vmem:[#allocation7 + $0x460] ss:$16 sps:$4 sm:$0xff]  }
  0x9d   :  { %1380 = vmatpush1.bf16.msra.mxu0 %v3652_v20  ;;  %1552 = vmatpush1.bf16.msra.mxu1 %v3655_v21  ;;  %v3748_v20 = vld [vmem:[#allocation7 + $0x468] ss:$16 sps:$4 sm:$0xff]   ;;  %v3753_v21 = vld [vmem:[#allocation7 + $0x484] ss:$16 sps:$4 sm:$0xff]  }
  0x9e   :  { %1381 = vmatprep.subr.bf16.mxu0 %v3660_v22  ;;  %1553 = vmatprep.subr.bf16.mxu1 %v3663_v23  ;;  %v3756_v22 = vld [vmem:[#allocation7 + $0x48c] ss:$16 sps:$4 sm:$0xff]   ;;  %v3751_v23 = vld [vmem:[#allocation7 + $0x480] ss:$16 sps:$4 sm:$0xff]  }
  0xa1   :  { %1382 = vmatpush1.bf16.msra.mxu0 %v3658_v24  ;;  %1554 = vmatpush1.bf16.msra.mxu1 %v3661_v25  ;;  %v3754_v24 = vld [vmem:[#allocation7 + $0x488] ss:$16 sps:$4 sm:$0xff]   ;;  %v3759_v25 = vld [vmem:[#allocation7 + $0x4a4] ss:$16 sps:$4 sm:$0xff]  }
  0xa2   :  { %1383 = vmatprep.subr.bf16.mxu0 %v3666_v26  ;;  %1555 = vmatprep.subr.bf16.mxu1 %v3669_v27  ;;  %v3762_v26 = vld [vmem:[#allocation7 + $0x4ac] ss:$16 sps:$4 sm:$0xff]   ;;  %v3757_v27 = vld [vmem:[#allocation7 + $0x4a0] ss:$16 sps:$4 sm:$0xff]  }
  0xa5   :  { %1384 = vmatpush1.bf16.msra.mxu0 %v3664_v28  ;;  %1556 = vmatpush1.bf16.msra.mxu1 %v3667_v29  ;;  %v3760_v28 = vld [vmem:[#allocation7 + $0x4a8] ss:$16 sps:$4 sm:$0xff]   ;;  %v3765_v29 = vld [vmem:[#allocation7 + $0x4c4] ss:$16 sps:$4 sm:$0xff]  }
  0xa6   :  { %1385 = vmatprep.subr.bf16.mxu0 %v3672_v31  ;;  %1557 = vmatprep.subr.bf16.mxu1 %v3675_v32  ;;  %v3763_v31 = vld [vmem:[#allocation7 + $0x4c0] ss:$16 sps:$4 sm:$0xff]   ;;  %v3766_v32 = vld [vmem:[#allocation7 + $0x4c8] ss:$16 sps:$4 sm:$0xff]  }
  0xa9   :  { %1386 = vmatpush1.bf16.msra.mxu0 %v3670_v33  ;;  %1558 = vmatpush1.bf16.msra.mxu1 %v3673_v34  ;;  %v3771_v33 = vld [vmem:[#allocation7 + $0x4e4] ss:$16 sps:$4 sm:$0xff]   ;;  %v3774_v34 = vld [vmem:[#allocation7 + $0x4ec] ss:$16 sps:$4 sm:$0xff]  }
  0xaa   :  { %1387 = vmatprep.subr.bf16.mxu0 %v3678_v35  ;;  %1559 = vmatprep.subr.bf16.mxu1 %v3681_v36  ;;  %v3769_v35 = vld [vmem:[#allocation7 + $0x4e0] ss:$16 sps:$4 sm:$0xff]   ;;  %v3772_v36 = vld [vmem:[#allocation7 + $0x4e8] ss:$16 sps:$4 sm:$0xff]  }
  0xad   :  { %1388 = vmatpush1.bf16.msra.mxu0 %v3676_v37  ;;  %1560 = vmatpush1.bf16.msra.mxu1 %v3679_v38  ;;  %v3777_v37 = vld [vmem:[#allocation7 + $0x504] ss:$16 sps:$4 sm:$0xff]   ;;  %v3780_v38 = vld [vmem:[#allocation7 + $0x50c] ss:$16 sps:$4 sm:$0xff]  }
  0xae   :  { %1389 = vmatprep.subr.bf16.mxu0 %v3684_v39  ;;  %1561 = vmatprep.subr.bf16.mxu1 %v3687_v40  ;;  %v3775_v39 = vld [vmem:[#allocation7 + $0x500] ss:$16 sps:$4 sm:$0xff]   ;;  %v3778_v40 = vld [vmem:[#allocation7 + $0x508] ss:$16 sps:$4 sm:$0xff]  }
  0xb1   :  { %1390 = vmatpush1.bf16.msra.mxu0 %v3682_v41  ;;  %1562 = vmatpush1.bf16.msra.mxu1 %v3685_v42  ;;  %v3783_v41 = vld [vmem:[#allocation7 + $0x524] ss:$16 sps:$4 sm:$0xff]   ;;  %v3786_v42 = vld [vmem:[#allocation7 + $0x52c] ss:$16 sps:$4 sm:$0xff]  }
  0xb2   :  { %1391 = vmatprep.subr.bf16.mxu0 %v3690_v43  ;;  %1563 = vmatprep.subr.bf16.mxu1 %v3693_v44  ;;  %v3781_v43 = vld [vmem:[#allocation7 + $0x520] ss:$16 sps:$4 sm:$0xff]   ;;  %v3784_v44 = vld [vmem:[#allocation7 + $0x528] ss:$16 sps:$4 sm:$0xff]  }
  0xb5   :  { %1392 = vmatpush1.bf16.msra.mxu0 %v3688_v45  ;;  %1564 = vmatpush1.bf16.msra.mxu1 %v3691_v46  ;;  %v3789_v45 = vld [vmem:[#allocation7 + $0x544] ss:$16 sps:$4 sm:$0xff]   ;;  %v3792_v46 = vld [vmem:[#allocation7 + $0x54c] ss:$16 sps:$4 sm:$0xff]  }
  0xb6   :  { %1393 = vmatprep.subr.bf16.mxu0 %v3696_v47  ;;  %1565 = vmatprep.subr.bf16.mxu1 %v3699_v48  ;;  %v3787_v47 = vld [vmem:[#allocation7 + $0x540] ss:$16 sps:$4 sm:$0xff]   ;;  %v3790_v48 = vld [vmem:[#allocation7 + $0x548] ss:$16 sps:$4 sm:$0xff]  }
  0xb9   :  { %1394 = vmatpush1.bf16.msra.mxu0 %v3694_v49  ;;  %1566 = vmatpush1.bf16.msra.mxu1 %v3697_v50  ;;  %v3795_v49 = vld [vmem:[#allocation7 + $0x564] ss:$16 sps:$4 sm:$0xff]   ;;  %v3798_v50 = vld [vmem:[#allocation7 + $0x56c] ss:$16 sps:$4 sm:$0xff]  }
  0xba   :  { %1395 = vmatprep.subr.bf16.mxu0 %v3702_v51  ;;  %1567 = vmatprep.subr.bf16.mxu1 %v3705_v52  ;;  %v3793_v51 = vld [vmem:[#allocation7 + $0x560] ss:$16 sps:$4 sm:$0xff]   ;;  %v3796_v52 = vld [vmem:[#allocation7 + $0x568] ss:$16 sps:$4 sm:$0xff]  }
  0xbd   :  { %1396 = vmatpush1.bf16.msra.mxu0 %v3700_v53  ;;  %1568 = vmatpush1.bf16.msra.mxu1 %v3703_v54  ;;  %v3801_v53 = vld [vmem:[#allocation7 + $0x584] ss:$16 sps:$4 sm:$0xff]   ;;  %v3804_v54 = vld [vmem:[#allocation7 + $0x58c] ss:$16 sps:$4 sm:$0xff]  }
  0xbe   :  { %1397 = vmatprep.subr.bf16.mxu0 %v3708_v55  ;;  %1569 = vmatprep.subr.bf16.mxu1 %v3711_v56  ;;  %v3799_v55 = vld [vmem:[#allocation7 + $0x580] ss:$16 sps:$4 sm:$0xff]   ;;  %v3802_v56 = vld [vmem:[#allocation7 + $0x588] ss:$16 sps:$4 sm:$0xff]  }
  0xc1   :  { %1398 = vmatpush1.bf16.msra.mxu0 %v3706_v57  ;;  %1570 = vmatpush1.bf16.msra.mxu1 %v3709_v58  ;;  %v3807_v57 = vld [vmem:[#allocation7 + $0x5a4] ss:$16 sps:$4 sm:$0xff]   ;;  %v3810_v58 = vld [vmem:[#allocation7 + $0x5ac] ss:$16 sps:$4 sm:$0xff]  }
  0xc2   :  { %1399 = vmatprep.subr.bf16.mxu0 %v3714_v59  ;;  %1571 = vmatprep.subr.bf16.mxu1 %v3717_v60  ;;  %v3805_v59 = vld [vmem:[#allocation7 + $0x5a0] ss:$16 sps:$4 sm:$0xff]   ;;  %v3808_v60 = vld [vmem:[#allocation7 + $0x5a8] ss:$16 sps:$4 sm:$0xff]  }
  0xc5   :  { %1400 = vmatpush1.bf16.msra.mxu0 %v3712_v61  ;;  %1572 = vmatpush1.bf16.msra.mxu1 %v3715_v62  ;;  %v3813_v61 = vld [vmem:[#allocation7 + $0x5c4] ss:$16 sps:$4 sm:$0xff]   ;;  %v3816_v62 = vld [vmem:[#allocation7 + $0x5cc] ss:$16 sps:$4 sm:$0xff]  }
  0xc6   :  { %1401 = vmatprep.subr.bf16.mxu0 %v3720_v63  ;;  %1573 = vmatprep.subr.bf16.mxu1 %v3723_v0  ;;  %v3811_v63 = vld [vmem:[#allocation7 + $0x5c0] ss:$16 sps:$4 sm:$0xff]   ;;  %v3814_v0 = vld [vmem:[#allocation7 + $0x5c8] ss:$16 sps:$4 sm:$0xff]  }
  0xc9   :  { %1402 = vmatpush1.bf16.msra.mxu0 %v3718_v1  ;;  %1574 = vmatpush1.bf16.msra.mxu1 %v3721_v2  ;;  %v3819_v1 = vld [vmem:[#allocation7 + $0x5e4] ss:$16 sps:$4 sm:$0xff]   ;;  %v3822_v2 = vld [vmem:[#allocation7 + $0x5ec] ss:$16 sps:$4 sm:$0xff]  }
  0xca   :  { %1414 = vmatprep.subr.bf16.mxu0 %v3729_v3  ;;  %1586 = vmatprep.subr.bf16.mxu1 %v3732_v4  ;;  %v3817_v3 = vld [vmem:[#allocation7 + $0x5e0] ss:$16 sps:$4 sm:$0xff]   ;;  %v3820_v4 = vld [vmem:[#allocation7 + $0x5e8] ss:$16 sps:$4 sm:$0xff]  }
  0xcc   :  { %1404 = vmatmul.mubr.bf16.vlgmr.msra.gmra.mrb[0].mxu0 %v3724_v5  ;;  %1576 = vmatmul.mubr.bf16.vlgmr.msra.gmra.mrb[0].mxu1 %v3724_v5  ;;  %v3828_v5 = vld [vmem:[#allocation7 + $0x604] ss:$16 sps:$4 sm:$0xff]  }
  0xcd   :  { %1415 = vmatpush1.bf16.msra.mxu0 %v3727_v6  ;;  %1587 = vmatpush1.bf16.msra.mxu1 %v3730_v7  ;;  %v3831_v6 = vld [vmem:[#allocation7 + $0x60c] ss:$16 sps:$4 sm:$0xff]   ;;  %v3823_v7 = vld [vmem:[#allocation4 + $0x10] ss:$28 sps:$4 sm:$0xff]  }
  0xce   :  { %1416 = vmatprep.subr.bf16.mxu0 %v3735_v8  ;;  %1588 = vmatprep.subr.bf16.mxu1 %v3738_v9  ;;  %v3826_v8 = vld [vmem:[#allocation7 + $0x600] ss:$16 sps:$4 sm:$0xff]   ;;  %v3829_v9 = vld [vmem:[#allocation7 + $0x608] ss:$16 sps:$4 sm:$0xff]  }
  0xcf   :  { %1446 = vmatprep.mubr.bf16.mxu0 %v3825_v12  ;;  %1618 = vmatprep.mubr.bf16.mxu1 %v3825_v12  ;;  %v4185_v12 = vmov 0  }
  0xd1   :  { %1417 = vmatpush1.bf16.msra.mxu0 %v3733_v10  ;;  %1589 = vmatpush1.bf16.msra.mxu1 %v3736_v11  ;;  %v3835_v10 = vld [vmem:[#allocation9 + $0x4] ss:$16 sps:$4 sm:$0xff]   ;;  %v3838_v11 = vld [vmem:[#allocation9 + $0xc] ss:$16 sps:$4 sm:$0xff]  }
  0xd2   :  { %1418 = vmatprep.subr.bf16.mxu0 %v3741_v13  ;;  %1590 = vmatprep.subr.bf16.mxu1 %v3744_v14  ;;  %v3832_v13 = vld [vmem:[#allocation4 + $0x18] ss:$28 sps:$4 sm:$0xff]  }
  0xd3   :  { %v3833_v14 = vld [vmem:[#allocation9] ss:$16 sps:$4 sm:$0xff]  }
  0xd5   :  { %1419 = vmatpush1.bf16.msra.mxu0 %v3739_v15  ;;  %1591 = vmatpush1.bf16.msra.mxu1 %v3742_v16  ;;  %v3836_v15 = vld [vmem:[#allocation9 + $0x8] ss:$16 sps:$4 sm:$0xff]   ;;  %v3841_v16 = vld [vmem:[#allocation9 + $0x24] ss:$16 sps:$4 sm:$0xff]  }
  0xd6   :  { %1420 = vmatprep.subr.bf16.mxu0 %v3747_v17  ;;  %1592 = vmatprep.subr.bf16.mxu1 %v3750_v18  ;;  %v3844_v17 = vld [vmem:[#allocation9 + $0x2c] ss:$16 sps:$4 sm:$0xff]   ;;  %v3839_v18 = vld [vmem:[#allocation9 + $0x20] ss:$16 sps:$4 sm:$0xff]  }
  0xd9   :  { %1421 = vmatpush1.bf16.msra.mxu0 %v3745_v19  ;;  %1593 = vmatpush1.bf16.msra.mxu1 %v3748_v20  ;;  %v3842_v19 = vld [vmem:[#allocation9 + $0x28] ss:$16 sps:$4 sm:$0xff]   ;;  %v3847_v20 = vld [vmem:[#allocation9 + $0x44] ss:$16 sps:$4 sm:$0xff]  }
  0xda   :  { %1422 = vmatprep.subr.bf16.mxu0 %v3753_v21  ;;  %1594 = vmatprep.subr.bf16.mxu1 %v3756_v22  ;;  %v3850_v21 = vld [vmem:[#allocation9 + $0x4c] ss:$16 sps:$4 sm:$0xff]   ;;  %v3845_v22 = vld [vmem:[#allocation9 + $0x40] ss:$16 sps:$4 sm:$0xff]  }
  0xdd   :  { %1423 = vmatpush1.bf16.msra.mxu0 %v3751_v23  ;;  %1595 = vmatpush1.bf16.msra.mxu1 %v3754_v24  ;;  %v3848_v23 = vld [vmem:[#allocation9 + $0x48] ss:$16 sps:$4 sm:$0xff]   ;;  %v3853_v24 = vld [vmem:[#allocation9 + $0x64] ss:$16 sps:$4 sm:$0xff]  }
  0xde   :  { %1424 = vmatprep.subr.bf16.mxu0 %v3759_v25  ;;  %1596 = vmatprep.subr.bf16.mxu1 %v3762_v26  ;;  %v3856_v25 = vld [vmem:[#allocation9 + $0x6c] ss:$16 sps:$4 sm:$0xff]   ;;  %v3851_v26 = vld [vmem:[#allocation9 + $0x60] ss:$16 sps:$4 sm:$0xff]  }
  0xe1   :  { %1425 = vmatpush1.bf16.msra.mxu0 %v3757_v27  ;;  %1597 = vmatpush1.bf16.msra.mxu1 %v3760_v28  ;;  %v3854_v27 = vld [vmem:[#allocation9 + $0x68] ss:$16 sps:$4 sm:$0xff]   ;;  %v3859_v28 = vld [vmem:[#allocation9 + $0x84] ss:$16 sps:$4 sm:$0xff]  }
  0xe2   :  { %1426 = vmatprep.subr.bf16.mxu0 %v3765_v29  ;;  %1598 = vmatprep.subr.bf16.mxu1 %v3768_v30  ;;  %v3862_v29 = vld [vmem:[#allocation9 + $0x8c] ss:$16 sps:$4 sm:$0xff]   ;;  %v3857_v30 = vld [vmem:[#allocation9 + $0x80] ss:$16 sps:$4 sm:$0xff]  }
  0xe5   :  { %1427 = vmatpush1.bf16.msra.mxu0 %v3763_v31  ;;  %1599 = vmatpush1.bf16.msra.mxu1 %v3766_v32  ;;  %v3860_v31 = vld [vmem:[#allocation9 + $0x88] ss:$16 sps:$4 sm:$0xff]   ;;  %v3865_v32 = vld [vmem:[#allocation9 + $0xa4] ss:$16 sps:$4 sm:$0xff]  }
  0xe6   :  { %1428 = vmatprep.subr.bf16.mxu0 %v3771_v33  ;;  %1600 = vmatprep.subr.bf16.mxu1 %v3774_v34  ;;  %v3868_v33 = vld [vmem:[#allocation9 + $0xac] ss:$16 sps:$4 sm:$0xff]   ;;  %v3863_v34 = vld [vmem:[#allocation9 + $0xa0] ss:$16 sps:$4 sm:$0xff]  }
  0xe9   :  { %1429 = vmatpush1.bf16.msra.mxu0 %v3769_v35  ;;  %1601 = vmatpush1.bf16.msra.mxu1 %v3772_v36  ;;  %v3866_v35 = vld [vmem:[#allocation9 + $0xa8] ss:$16 sps:$4 sm:$0xff]   ;;  %v3871_v36 = vld [vmem:[#allocation9 + $0xc4] ss:$16 sps:$4 sm:$0xff]  }
  0xea   :  { %1430 = vmatprep.subr.bf16.mxu0 %v3777_v37  ;;  %1602 = vmatprep.subr.bf16.mxu1 %v3780_v38  ;;  %v3874_v37 = vld [vmem:[#allocation9 + $0xcc] ss:$16 sps:$4 sm:$0xff]   ;;  %v3869_v38 = vld [vmem:[#allocation9 + $0xc0] ss:$16 sps:$4 sm:$0xff]  }
  0xed   :  { %1431 = vmatpush1.bf16.msra.mxu0 %v3775_v39  ;;  %1603 = vmatpush1.bf16.msra.mxu1 %v3778_v40  ;;  %v3872_v39 = vld [vmem:[#allocation9 + $0xc8] ss:$16 sps:$4 sm:$0xff]   ;;  %v3877_v40 = vld [vmem:[#allocation9 + $0xe4] ss:$16 sps:$4 sm:$0xff]  }
  0xee   :  { %1432 = vmatprep.subr.bf16.mxu0 %v3783_v41  ;;  %1604 = vmatprep.subr.bf16.mxu1 %v3786_v42  ;;  %v3880_v41 = vld [vmem:[#allocation9 + $0xec] ss:$16 sps:$4 sm:$0xff]   ;;  %v3875_v42 = vld [vmem:[#allocation9 + $0xe0] ss:$16 sps:$4 sm:$0xff]  }
  0xf1   :  { %1433 = vmatpush1.bf16.msra.mxu0 %v3781_v43  ;;  %1605 = vmatpush1.bf16.msra.mxu1 %v3784_v44  ;;  %v3878_v43 = vld [vmem:[#allocation9 + $0xe8] ss:$16 sps:$4 sm:$0xff]   ;;  %v3883_v44 = vld [vmem:[#allocation9 + $0x104] ss:$16 sps:$4 sm:$0xff]  }
  0xf2   :  { %1434 = vmatprep.subr.bf16.mxu0 %v3789_v45  ;;  %1606 = vmatprep.subr.bf16.mxu1 %v3792_v46  ;;  %v3886_v45 = vld [vmem:[#allocation9 + $0x10c] ss:$16 sps:$4 sm:$0xff]   ;;  %v3881_v46 = vld [vmem:[#allocation9 + $0x100] ss:$16 sps:$4 sm:$0xff]  }
  0xf5   :  { %1435 = vmatpush1.bf16.msra.mxu0 %v3787_v47  ;;  %1607 = vmatpush1.bf16.msra.mxu1 %v3790_v48  ;;  %v3884_v47 = vld [vmem:[#allocation9 + $0x108] ss:$16 sps:$4 sm:$0xff]   ;;  %v3889_v48 = vld [vmem:[#allocation9 + $0x124] ss:$16 sps:$4 sm:$0xff]  }
  0xf6   :  { %1436 = vmatprep.subr.bf16.mxu0 %v3795_v49  ;;  %1608 = vmatprep.subr.bf16.mxu1 %v3798_v50  ;;  %v3892_v49 = vld [vmem:[#allocation9 + $0x12c] ss:$16 sps:$4 sm:$0xff]   ;;  %v3887_v50 = vld [vmem:[#allocation9 + $0x120] ss:$16 sps:$4 sm:$0xff]  }
  0xf9   :  { %1437 = vmatpush1.bf16.msra.mxu0 %v3793_v51  ;;  %1609 = vmatpush1.bf16.msra.mxu1 %v3796_v52  ;;  %v3890_v51 = vld [vmem:[#allocation9 + $0x128] ss:$16 sps:$4 sm:$0xff]   ;;  %v3895_v52 = vld [vmem:[#allocation9 + $0x144] ss:$16 sps:$4 sm:$0xff]  }
  0xfa   :  { %1438 = vmatprep.subr.bf16.mxu0 %v3801_v53  ;;  %1610 = vmatprep.subr.bf16.mxu1 %v3804_v54  ;;  %v3898_v53 = vld [vmem:[#allocation9 + $0x14c] ss:$16 sps:$4 sm:$0xff]   ;;  %v3893_v54 = vld [vmem:[#allocation9 + $0x140] ss:$16 sps:$4 sm:$0xff]  }
  0xfd   :  { %1439 = vmatpush1.bf16.msra.mxu0 %v3799_v55  ;;  %1611 = vmatpush1.bf16.msra.mxu1 %v3802_v56  ;;  %v3896_v55 = vld [vmem:[#allocation9 + $0x148] ss:$16 sps:$4 sm:$0xff]   ;;  %v3901_v56 = vld [vmem:[#allocation9 + $0x164] ss:$16 sps:$4 sm:$0xff]  }
  0xfe   :  { %1440 = vmatprep.subr.bf16.mxu0 %v3807_v57  ;;  %1612 = vmatprep.subr.bf16.mxu1 %v3810_v58  ;;  %v3904_v57 = vld [vmem:[#allocation9 + $0x16c] ss:$16 sps:$4 sm:$0xff]   ;;  %v3899_v58 = vld [vmem:[#allocation9 + $0x160] ss:$16 sps:$4 sm:$0xff]  }
 0x101   :  { %1441 = vmatpush1.bf16.msra.mxu0 %v3805_v59  ;;  %1613 = vmatpush1.bf16.msra.mxu1 %v3808_v60  ;;  %v3902_v59 = vld [vmem:[#allocation9 + $0x168] ss:$16 sps:$4 sm:$0xff]   ;;  %v3907_v60 = vld [vmem:[#allocation9 + $0x184] ss:$16 sps:$4 sm:$0xff]  }
 0x102   :  { %1442 = vmatprep.subr.bf16.mxu0 %v3813_v61  ;;  %1614 = vmatprep.subr.bf16.mxu1 %v3816_v62  ;;  %v3910_v61 = vld [vmem:[#allocation9 + $0x18c] ss:$16 sps:$4 sm:$0xff]   ;;  %v3905_v62 = vld [vmem:[#allocation9 + $0x180] ss:$16 sps:$4 sm:$0xff]  }
 0x105   :  { %1443 = vmatpush1.bf16.msra.mxu0 %v3811_v63  ;;  %1615 = vmatpush1.bf16.msra.mxu1 %v3814_v0  ;;  %v3908_v63 = vld [vmem:[#allocation9 + $0x188] ss:$16 sps:$4 sm:$0xff]   ;;  %v3913_v0 = vld [vmem:[#allocation9 + $0x1a4] ss:$16 sps:$4 sm:$0xff]  }
 0x106   :  { %1444 = vmatprep.subr.bf16.mxu0 %v3819_v1  ;;  %1616 = vmatprep.subr.bf16.mxu1 %v3822_v2  ;;  %v3916_v1 = vld [vmem:[#allocation9 + $0x1ac] ss:$16 sps:$4 sm:$0xff]   ;;  %v3911_v2 = vld [vmem:[#allocation9 + $0x1a0] ss:$16 sps:$4 sm:$0xff]  }
 0x109   :  { %1445 = vmatpush1.bf16.msra.mxu0 %v3817_v3  ;;  %1617 = vmatpush1.bf16.msra.mxu1 %v3820_v4  ;;  %v3914_v3 = vld [vmem:[#allocation9 + $0x1a8] ss:$16 sps:$4 sm:$0xff]   ;;  %v3919_v4 = vld [vmem:[#allocation9 + $0x1c4] ss:$16 sps:$4 sm:$0xff]  }
 0x10a   :  { %1457 = vmatprep.subr.bf16.mxu0 %v3828_v5  ;;  %1629 = vmatprep.subr.bf16.mxu1 %v3831_v6  ;;  %v3922_v5 = vld [vmem:[#allocation9 + $0x1cc] ss:$16 sps:$4 sm:$0xff]   ;;  %v3917_v6 = vld [vmem:[#allocation9 + $0x1c0] ss:$16 sps:$4 sm:$0xff]  }
 0x10c   :  { %1447 = vmatmul.mubr.bf16.vlgmr.msra.gmra.mrb[0].mxu0 %v3823_v7  ;;  %1619 = vmatmul.mubr.bf16.vlgmr.msra.gmra.mrb[0].mxu1 %v3823_v7  ;;  %v3920_v7 = vld [vmem:[#allocation9 + $0x1c8] ss:$16 sps:$4 sm:$0xff]  }
 0x10d   :  { %1458 = vmatpush1.bf16.msra.mxu0 %v3826_v8  ;;  %1630 = vmatpush1.bf16.msra.mxu1 %v3829_v9  ;;  %v3925_v8 = vld [vmem:[#allocation9 + $0x1e4] ss:$16 sps:$4 sm:$0xff]   ;;  %v3928_v9 = vld [vmem:[#allocation9 + $0x1ec] ss:$16 sps:$4 sm:$0xff]  }
 0x10e   :  { %1489 = vmatprep.mubr.bf16.mxu0 %v4185_v12  ;;  %1661 = vmatprep.mubr.bf16.mxu1 %v4185_v12  ;;  %v3931_v12 = vld [vmem:[#allocation9 + $0x204] ss:$16 sps:$4 sm:$0xff]  }
 0x10f   :  { %2482 = vmatprep.subr.bf16.mxu0 %v3835_v10  ;;  %2568 = vmatprep.subr.bf16.mxu1 %v3838_v11  ;;  %v3923_v10 = vld [vmem:[#allocation9 + $0x1e0] ss:$16 sps:$4 sm:$0xff]   ;;  %v3926_v11 = vld [vmem:[#allocation9 + $0x1e8] ss:$16 sps:$4 sm:$0xff]  }
 0x118   :  { %3253 = vmatmul.mubr.msk.bf16.vlgmr.msra.gmra.mrb[0].mxu0 %vm1324_vm0, %v3832_v13  ;;  %3254 = vmatmul.mubr.msk.bf16.vlgmr.msra.gmra.mrb[0].mxu1 %vm1324_vm0, %v3832_v13  ;;  %v3934_v13 = vld [vmem:[#allocation9 + $0x20c] ss:$16 sps:$4 sm:$0xff]  }
 0x119   :  { %2483 = vmatpush1.bf16.msra.mxu0 %v3833_v14  ;;  %2569 = vmatpush1.bf16.msra.mxu1 %v3836_v15  ;;  %v289_v14 = vlaneseq }
 0x11a   :  { %2484 = vmatprep.subr.bf16.mxu0 %v3841_v16  ;;  %2570 = vmatprep.subr.bf16.mxu1 %v3844_v17 }
 0x11b   :  { %v4291_v15 = vshrl.u32 %v289_v14, 7  ;;  %v3968_v14 = vld [vmem:[#allocation9 + $0x2c8] ss:$16 sps:$4 sm:$0xff]  }
 0x11d   :  { %2485 = vmatpush1.bf16.msra.mxu0 %v3839_v18  ;;  %2571 = vmatpush1.bf16.msra.mxu1 %v3842_v19  ;;  %v291_v16 = vsub.s32 0, %v4291_v15  ;;  %v299_v17 = vsub.s32 2, %v4291_v15  ;;  %v287_v18 = vld [vmem:[%s4343_s2] sm:$0xf]  ;;  %v295_v19 = vsub.s32 1, %v4291_v15 }
 0x11e   :  { %2486 = vmatprep.subr.bf16.mxu0 %v3847_v20  ;;  %2572 = vmatprep.subr.bf16.mxu1 %v3850_v21  ;;  %v303_v20 = vsub.s32 3, %v4291_v15 }
 0x11f   :  { %v292_v21 = vrot.slane %v287_v18, %v291_v16 }
 0x121   :  { %2487 = vmatpush1.bf16.msra.mxu0 %v3845_v22  ;;  %2573 = vmatpush1.bf16.msra.mxu1 %v3848_v23  ;;  %v300_v22 = vrot.slane %v287_v18, %v299_v17  ;;  %v296_v23 = vrot.slane %v287_v18, %v295_v19 }
 0x122   :  { %2488 = vmatprep.subr.bf16.mxu0 %v3853_v24  ;;  %2574 = vmatprep.subr.bf16.mxu1 %v3856_v25  ;;  %v304_v24 = vrot.slane %v287_v18, %v303_v20  ;;  %v3973_v18 = vld [vmem:[#allocation9 + $0x2e4] ss:$16 sps:$4 sm:$0xff]  }
 0x125   :  { %2489 = vmatpush1.bf16.msra.mxu0 %v3851_v26  ;;  %2575 = vmatpush1.bf16.msra.mxu1 %v3854_v27 }
 0x126   :  { %2490 = vmatprep.subr.bf16.mxu0 %v3859_v28  ;;  %2576 = vmatprep.subr.bf16.mxu1 %v3862_v29 }
 0x129   :  { %2491 = vmatpush1.bf16.msra.mxu0 %v3857_v30  ;;  %2577 = vmatpush1.bf16.msra.mxu1 %v3860_v31 }
 0x12a   :  { %2492 = vmatprep.subr.bf16.mxu0 %v3865_v32  ;;  %2578 = vmatprep.subr.bf16.mxu1 %v3868_v33 }
 0x12d   :  { %2493 = vmatpush1.bf16.msra.mxu0 %v3863_v34  ;;  %2579 = vmatpush1.bf16.msra.mxu1 %v3866_v35 }
 0x12e   :  { %2494 = vmatprep.subr.bf16.mxu0 %v3871_v36  ;;  %2580 = vmatprep.subr.bf16.mxu1 %v3874_v37 }
 0x131   :  { %2495 = vmatpush1.bf16.msra.mxu0 %v3869_v38  ;;  %2581 = vmatpush1.bf16.msra.mxu1 %v3872_v39 }
 0x132   :  { %2496 = vmatprep.subr.bf16.mxu0 %v3877_v40  ;;  %2582 = vmatprep.subr.bf16.mxu1 %v3880_v41 }
 0x135   :  { %2497 = vmatpush1.bf16.msra.mxu0 %v3875_v42  ;;  %2583 = vmatpush1.bf16.msra.mxu1 %v3878_v43 }
 0x136   :  { %2498 = vmatprep.subr.bf16.mxu0 %v3883_v44  ;;  %2584 = vmatprep.subr.bf16.mxu1 %v3886_v45 }
 0x139   :  { %2499 = vmatpush1.bf16.msra.mxu0 %v3881_v46  ;;  %2585 = vmatpush1.bf16.msra.mxu1 %v3884_v47 }
 0x13a   :  { %2500 = vmatprep.subr.bf16.mxu0 %v3889_v48  ;;  %2586 = vmatprep.subr.bf16.mxu1 %v3892_v49 }
 0x13d   :  { %2501 = vmatpush1.bf16.msra.mxu0 %v3887_v50  ;;  %2587 = vmatpush1.bf16.msra.mxu1 %v3890_v51 }
 0x13e   :  { %2502 = vmatprep.subr.bf16.mxu0 %v3895_v52  ;;  %2588 = vmatprep.subr.bf16.mxu1 %v3898_v53  ;;  %v3929_v53 = vld [vmem:[#allocation9 + $0x200] ss:$16 sps:$4 sm:$0xff]  }
 0x141   :  { %2503 = vmatpush1.bf16.msra.mxu0 %v3893_v54  ;;  %2589 = vmatpush1.bf16.msra.mxu1 %v3896_v55  ;;  %v3932_v54 = vld [vmem:[#allocation9 + $0x208] ss:$16 sps:$4 sm:$0xff]   ;;  %v3937_v55 = vld [vmem:[#allocation9 + $0x224] ss:$16 sps:$4 sm:$0xff]  }
 0x142   :  { %2504 = vmatprep.subr.bf16.mxu0 %v3901_v56  ;;  %2590 = vmatprep.subr.bf16.mxu1 %v3904_v57  ;;  %v3940_v56 = vld [vmem:[#allocation9 + $0x22c] ss:$16 sps:$4 sm:$0xff]   ;;  %v3935_v57 = vld [vmem:[#allocation9 + $0x220] ss:$16 sps:$4 sm:$0xff]  }
 0x145   :  { %2505 = vmatpush1.bf16.msra.mxu0 %v3899_v58  ;;  %2591 = vmatpush1.bf16.msra.mxu1 %v3902_v59  ;;  %v3938_v58 = vld [vmem:[#allocation9 + $0x228] ss:$16 sps:$4 sm:$0xff]   ;;  %v3943_v59 = vld [vmem:[#allocation9 + $0x244] ss:$16 sps:$4 sm:$0xff]  }
 0x146   :  { %2506 = vmatprep.subr.bf16.mxu0 %v3907_v60  ;;  %2592 = vmatprep.subr.bf16.mxu1 %v3910_v61  ;;  %v3946_v60 = vld [vmem:[#allocation9 + $0x24c] ss:$16 sps:$4 sm:$0xff]   ;;  %v3941_v61 = vld [vmem:[#allocation9 + $0x240] ss:$16 sps:$4 sm:$0xff]  }
 0x149   :  { %2507 = vmatpush1.bf16.msra.mxu0 %v3905_v62  ;;  %2593 = vmatpush1.bf16.msra.mxu1 %v3908_v63  ;;  %v3944_v62 = vld [vmem:[#allocation9 + $0x248] ss:$16 sps:$4 sm:$0xff]   ;;  %v3949_v63 = vld [vmem:[#allocation9 + $0x264] ss:$16 sps:$4 sm:$0xff]  }
 0x14a   :  { %2508 = vmatprep.subr.bf16.mxu0 %v3913_v0  ;;  %2594 = vmatprep.subr.bf16.mxu1 %v3916_v1  ;;  %v3952_v0 = vld [vmem:[#allocation9 + $0x26c] ss:$16 sps:$4 sm:$0xff]   ;;  %v3947_v1 = vld [vmem:[#allocation9 + $0x260] ss:$16 sps:$4 sm:$0xff]  }
 0x14d   :  { %2509 = vmatpush1.bf16.msra.mxu0 %v3911_v2  ;;  %2595 = vmatpush1.bf16.msra.mxu1 %v3914_v3  ;;  %v3950_v2 = vld [vmem:[#allocation9 + $0x268] ss:$16 sps:$4 sm:$0xff]   ;;  %v3955_v3 = vld [vmem:[#allocation9 + $0x284] ss:$16 sps:$4 sm:$0xff]  }
 0x14e   :  { %2510 = vmatprep.subr.bf16.mxu0 %v3919_v4  ;;  %2596 = vmatprep.subr.bf16.mxu1 %v3922_v5  ;;  %v3958_v4 = vld [vmem:[#allocation9 + $0x28c] ss:$16 sps:$4 sm:$0xff]   ;;  %v3953_v5 = vld [vmem:[#allocation9 + $0x280] ss:$16 sps:$4 sm:$0xff]  }
 0x151   :  { %2511 = vmatpush1.bf16.msra.mxu0 %v3917_v6  ;;  %2597 = vmatpush1.bf16.msra.mxu1 %v3920_v7  ;;  %v3956_v6 = vld [vmem:[#allocation9 + $0x288] ss:$16 sps:$4 sm:$0xff]   ;;  %v3961_v7 = vld [vmem:[#allocation9 + $0x2a4] ss:$16 sps:$4 sm:$0xff]  }
 0x152   :  { %2512 = vmatprep.subr.bf16.mxu0 %v3925_v8  ;;  %2598 = vmatprep.subr.bf16.mxu1 %v3928_v9  ;;  %v3964_v8 = vld [vmem:[#allocation9 + $0x2ac] ss:$16 sps:$4 sm:$0xff]   ;;  %v3959_v9 = vld [vmem:[#allocation9 + $0x2a0] ss:$16 sps:$4 sm:$0xff]  }
 0x155   :  { %2513 = vmatpush1.bf16.msra.mxu0 %v3923_v10  ;;  %2599 = vmatpush1.bf16.msra.mxu1 %v3926_v11  ;;  %v3962_v10 = vld [vmem:[#allocation9 + $0x2a8] ss:$16 sps:$4 sm:$0xff]   ;;  %v3967_v11 = vld [vmem:[#allocation9 + $0x2c4] ss:$16 sps:$4 sm:$0xff]  }
 0x156   :  { %2525 = vmatprep.subr.bf16.mxu0 %v3931_v12  ;;  %2611 = vmatprep.subr.bf16.mxu1 %v3934_v13  ;;  %v3970_v12 = vld [vmem:[#allocation9 + $0x2cc] ss:$16 sps:$4 sm:$0xff]   ;;  %v3965_v13 = vld [vmem:[#allocation9 + $0x2c0] ss:$16 sps:$4 sm:$0xff]  }
 0x1eb   :  { %v1491_v25 = vpop.f32.mrb[0].mxu0  ;;  %v1663_v26 = vpop.f32.mrb[0].mxu1 }
 0x1ec   :  { %v3469_v27 = vadd.f32 %v1491_v25, %v292_v21  ;;  %v3473_v28 = vadd.f32 %v1663_v26, %v300_v22  ;;  %v1493_v29 = vpop.f32.mrb[1].mxu0  ;;  %v1665_v30 = vpop.f32.mrb[1].mxu1  ;;  %v3982_v25 = vld [vmem:[#allocation9 + $0x30c] ss:$16 sps:$4 sm:$0xff]   ;;  %v3977_v26 = vld [vmem:[#allocation9 + $0x300] ss:$16 sps:$4 sm:$0xff]  }
 0x1ed   :  { %v3470_v31 = vadd.f32 %v1493_v29, %v296_v23  ;;  %v3474_v32 = vadd.f32 %v1665_v30, %v304_v24  ;;  %v1495_v33 = vpop.f32.mrb[2].mxu0  ;;  %v1667_v34 = vpop.f32.mrb[2].mxu1  ;;  %v3988_v29 = vld [vmem:[#allocation9 + $0x32c] ss:$16 sps:$4 sm:$0xff]   ;;  %v3983_v30 = vld [vmem:[#allocation9 + $0x320] ss:$16 sps:$4 sm:$0xff]  }
 0x1ee   :  { %v3471_v35 = vadd.f32 %v1495_v33, %v292_v21  ;;  %v3475_v36 = vadd.f32 %v1667_v34, %v300_v22  ;;  %v1497_v37 = vpop.f32.mrb[3].mxu0  ;;  %v1669_v38 = vpop.f32.mrb[3].mxu1  ;;  %v1672_v41 = vmax.f32 %v3469_v27, 0.0  ;;  %v1674_v42 = vmax.f32 %v3473_v28, 0.0  ;;  %v3976_v21 = vld [vmem:[#allocation9 + $0x2ec] ss:$16 sps:$4 sm:$0xff]  }
 0x1ef   :  { %v3472_v39 = vadd.f32 %v1497_v37, %v296_v23  ;;  %v3476_v40 = vadd.f32 %v1669_v38, %v304_v24  ;;  %v1673_v45 = vmax.f32 %v3470_v31, 0.0  ;;  %v1675_v46 = vmax.f32 %v3474_v32, 0.0  ;;  %v3971_v22 = vld [vmem:[#allocation9 + $0x2e0] ss:$16 sps:$4 sm:$0xff]   ;;  %v3974_v23 = vld [vmem:[#allocation9 + $0x2e8] ss:$16 sps:$4 sm:$0xff]  }
 0x1f0   :  { %v1676_v43 = vmax.f32 %v3471_v35, 0.0  ;;  %v1678_v44 = vmax.f32 %v3475_v36, 0.0  ;;  %v3979_v24 = vld [vmem:[#allocation9 + $0x304] ss:$16 sps:$4 sm:$0xff]   ;;  %v3980_v27 = vld [vmem:[#allocation9 + $0x308] ss:$16 sps:$4 sm:$0xff]  }
 0x1f1   :  { %v1677_v47 = vmax.f32 %v3472_v39, 0.0  ;;  %v1679_v48 = vmax.f32 %v3476_v40, 0.0  ;;  %v3985_v28 = vld [vmem:[#allocation9 + $0x324] ss:$16 sps:$4 sm:$0xff]   ;;  %v3986_v31 = vld [vmem:[#allocation9 + $0x328] ss:$16 sps:$4 sm:$0xff]  }
 0x1f2   :  { %v1680_v49 = vpack.c.bf16 %v1676_v43, %v1672_v41  ;;  %v4308_v50 = vpack.c.bf16 %v1678_v44, %v1674_v42  ;;  %v3991_v32 = vld [vmem:[#allocation9 + $0x344] ss:$16 sps:$4 sm:$0xff]   ;;  %v3994_v33 = vld [vmem:[#allocation9 + $0x34c] ss:$16 sps:$4 sm:$0xff]   ;;  %v3989_v34 = vld [vmem:[#allocation9 + $0x340] ss:$16 sps:$4 sm:$0xff]  }
 0x1f3   :  { %v1681_v51 = vpack.c.bf16 %v1677_v47, %v1673_v45  ;;  %v1683_v52 = vpack.c.bf16 %v1679_v48, %v1675_v46  ;;  %v3992_v35 = vld [vmem:[#allocation9 + $0x348] ss:$16 sps:$4 sm:$0xff]   ;;  %v3997_v36 = vld [vmem:[#allocation9 + $0x364] ss:$16 sps:$4 sm:$0xff]   ;;  %v4000_v37 = vld [vmem:[#allocation9 + $0x36c] ss:$16 sps:$4 sm:$0xff]  }
 0x1f4   :  { %v3995_v38 = vld [vmem:[#allocation9 + $0x360] ss:$16 sps:$4 sm:$0xff]   ;;  %v3998_v39 = vld [vmem:[#allocation9 + $0x368] ss:$16 sps:$4 sm:$0xff]   ;;  %v4003_v40 = vld [vmem:[#allocation9 + $0x384] ss:$16 sps:$4 sm:$0xff]  }
 0x1f5   :  { %2514 = vmatprep.mubr.bf16.mxu0 %v1681_v51  ;;  %2600 = vmatprep.mubr.bf16.mxu1 %v1681_v51  ;;  %v4006_v41 = vld [vmem:[#allocation9 + $0x38c] ss:$16 sps:$4 sm:$0xff]   ;;  %v4001_v42 = vld [vmem:[#allocation9 + $0x380] ss:$16 sps:$4 sm:$0xff]   ;;  %v4004_v43 = vld [vmem:[#allocation9 + $0x388] ss:$16 sps:$4 sm:$0xff]  }
 0x1f6   :  { %2515 = vmatmul.mubr.bf16.vlgmr.msra.gmra.mrb[4].mxu0 %v1680_v49  ;;  %2601 = vmatmul.mubr.bf16.vlgmr.msra.gmra.mrb[4].mxu1 %v1680_v49  ;;  %v4009_v44 = vld [vmem:[#allocation9 + $0x3a4] ss:$16 sps:$4 sm:$0xff]   ;;  %v4012_v45 = vld [vmem:[#allocation9 + $0x3ac] ss:$16 sps:$4 sm:$0xff]   ;;  %v4007_v46 = vld [vmem:[#allocation9 + $0x3a0] ss:$16 sps:$4 sm:$0xff]  }
 0x1f7   :  { %2526 = vmatpush1.bf16.msra.mxu0 %v3929_v53  ;;  %2612 = vmatpush1.bf16.msra.mxu1 %v3932_v54  ;;  %v4010_v47 = vld [vmem:[#allocation9 + $0x3a8] ss:$16 sps:$4 sm:$0xff]   ;;  %v4015_v48 = vld [vmem:[#allocation9 + $0x3c4] ss:$16 sps:$4 sm:$0xff]   ;;  %v4018_v49 = vld [vmem:[#allocation9 + $0x3cc] ss:$16 sps:$4 sm:$0xff]  }
 0x1f8   :  { %2557 = vmatprep.mubr.bf16.mxu0 %v1683_v52  ;;  %2643 = vmatprep.mubr.bf16.mxu1 %v1683_v52  ;;  %v4013_v51 = vld [vmem:[#allocation9 + $0x3c0] ss:$16 sps:$4 sm:$0xff]   ;;  %v4016_v52 = vld [vmem:[#allocation9 + $0x3c8] ss:$16 sps:$4 sm:$0xff]   ;;  %v4021_v53 = vld [vmem:[#allocation9 + $0x3e4] ss:$16 sps:$4 sm:$0xff]  }
 0x1f9   :  { %2527 = vmatprep.subr.bf16.mxu0 %v3937_v55  ;;  %2613 = vmatprep.subr.bf16.mxu1 %v3940_v56  ;;  %v4024_v54 = vld [vmem:[#allocation9 + $0x3ec] ss:$16 sps:$4 sm:$0xff]   ;;  %v4019_v55 = vld [vmem:[#allocation9 + $0x3e0] ss:$16 sps:$4 sm:$0xff]   ;;  %v4022_v56 = vld [vmem:[#allocation9 + $0x3e8] ss:$16 sps:$4 sm:$0xff]  }
 0x1fb   :  { %2528 = vmatpush1.bf16.msra.mxu0 %v3935_v57  ;;  %2614 = vmatpush1.bf16.msra.mxu1 %v3938_v58  ;;  %v4025_v57 = vld [vmem:[#allocation10 + $0x40] sm:$0xff]  }
 0x1fc   :  { %2529 = vmatprep.subr.bf16.mxu0 %v3943_v59  ;;  %2615 = vmatprep.subr.bf16.mxu1 %v3946_v60  ;;  %v4026_v58 = vld [vmem:[#allocation10 + $0xc0] sm:$0xff]  }
 0x1fd   :  { %v4027_v59 = vld [vmem:[#allocation10] sm:$0xff]  }
 0x1fe   :  { %v4028_v60 = vld [vmem:[#allocation10 + $0x80] sm:$0xff]  }
 0x1ff   :  { %2530 = vmatpush1.bf16.msra.mxu0 %v3941_v61  ;;  %2616 = vmatpush1.bf16.msra.mxu1 %v3944_v62  ;;  %v4029_v61 = vld [vmem:[#allocation10 + $0x48] sm:$0xff]  }
 0x200   :  { %2531 = vmatprep.subr.bf16.mxu0 %v3949_v63  ;;  %2617 = vmatprep.subr.bf16.mxu1 %v3952_v0  ;;  %v4030_v62 = vld [vmem:[#allocation10 + $0xc8] sm:$0xff]  }
 0x201   :  { %v4031_v63 = vld [vmem:[#allocation10 + $0x8] sm:$0xff]  }
 0x202   :  { %v4032_v0 = vld [vmem:[#allocation10 + $0x88] sm:$0xff]  }
 0x203   :  { %2532 = vmatpush1.bf16.msra.mxu0 %v3947_v1  ;;  %2618 = vmatpush1.bf16.msra.mxu1 %v3950_v2  ;;  %v4033_v1 = vld [vmem:[#allocation10 + $0x50] sm:$0xff]  }
 0x204   :  { %2533 = vmatprep.subr.bf16.mxu0 %v3955_v3  ;;  %2619 = vmatprep.subr.bf16.mxu1 %v3958_v4  ;;  %v4034_v2 = vld [vmem:[#allocation10 + $0xd0] sm:$0xff]  }
 0x205   :  { %v4035_v3 = vld [vmem:[#allocation10 + $0x10] sm:$0xff]  }
 0x206   :  { %v4036_v4 = vld [vmem:[#allocation10 + $0x90] sm:$0xff]  }
 0x207   :  { %2534 = vmatpush1.bf16.msra.mxu0 %v3953_v5  ;;  %2620 = vmatpush1.bf16.msra.mxu1 %v3956_v6  ;;  %v4037_v5 = vld [vmem:[#allocation10 + $0x58] sm:$0xff]  }
 0x208   :  { %2535 = vmatprep.subr.bf16.mxu0 %v3961_v7  ;;  %2621 = vmatprep.subr.bf16.mxu1 %v3964_v8  ;;  %v4038_v6 = vld [vmem:[#allocation10 + $0xd8] sm:$0xff]   ;;  %v4041_v8 = vld [vmem:[#allocation10 + $0x60] sm:$0xff]  }
 0x209   :  { %v4039_v7 = vld [vmem:[#allocation10 + $0x18] sm:$0xff]  }
 0x20b   :  { %2536 = vmatpush1.bf16.msra.mxu0 %v3959_v9  ;;  %2622 = vmatpush1.bf16.msra.mxu1 %v3962_v10  ;;  %v4042_v9 = vld [vmem:[#allocation10 + $0xe0] sm:$0xff]  }
 0x20c   :  { %2537 = vmatprep.subr.bf16.mxu0 %v3967_v11  ;;  %2623 = vmatprep.subr.bf16.mxu1 %v3970_v12  ;;  %v4043_v10 = vld [vmem:[#allocation10 + $0x20] sm:$0xff]   ;;  %v4045_v12 = vld [vmem:[#allocation10 + $0x68] sm:$0xff]  }
 0x20d   :  { %v4044_v11 = vld [vmem:[#allocation10 + $0xa0] sm:$0xff]  }
 0x20f   :  { %2538 = vmatpush1.bf16.msra.mxu0 %v3965_v13  ;;  %2624 = vmatpush1.bf16.msra.mxu1 %v3968_v14  ;;  %v4046_v13 = vld [vmem:[#allocation10 + $0xe8] sm:$0xff]  }
 0x210   :  { %2539 = vmatprep.subr.bf16.mxu0 %v3973_v18  ;;  %2625 = vmatprep.subr.bf16.mxu1 %v3976_v21  ;;  %v4047_v14 = vld [vmem:[#allocation10 + $0x28] sm:$0xff]   ;;  %v4049_v21 = vld [vmem:[#allocation10 + $0x70] sm:$0xff]  }
 0x211   :  { %v4048_v18 = vld [vmem:[#allocation10 + $0xa8] sm:$0xff]  }
 0x213   :  { %2540 = vmatpush1.bf16.msra.mxu0 %v3971_v22  ;;  %2626 = vmatpush1.bf16.msra.mxu1 %v3974_v23  ;;  %v4050_v22 = vld [vmem:[#allocation10 + $0xf0] sm:$0xff]  }
 0x214   :  { %2541 = vmatprep.subr.bf16.mxu0 %v3979_v24  ;;  %2627 = vmatprep.subr.bf16.mxu1 %v3982_v25  ;;  %v4051_v23 = vld [vmem:[#allocation10 + $0x30] sm:$0xff]   ;;  %v4053_v25 = vld [vmem:[#allocation10 + $0x78] sm:$0xff]  }
 0x215   :  { %v4052_v24 = vld [vmem:[#allocation10 + $0xb0] sm:$0xff]  }
 0x217   :  { %2542 = vmatpush1.bf16.msra.mxu0 %v3977_v26  ;;  %2628 = vmatpush1.bf16.msra.mxu1 %v3980_v27  ;;  %v4054_v26 = vld [vmem:[#allocation10 + $0xf8] sm:$0xff]  }
 0x218   :  { %2543 = vmatprep.subr.bf16.mxu0 %v3985_v28  ;;  %2629 = vmatprep.subr.bf16.mxu1 %v3988_v29  ;;  %v4055_v27 = vld [vmem:[#allocation10 + $0x38] sm:$0xff]   ;;  %v1820_v29 = vld [vmem:[%s4345_s4] sm:$0xf] }
 0x219   :  { %v4056_v28 = vld [vmem:[#allocation10 + $0xb8] sm:$0xff]  }
 0x21b   :  { %2544 = vmatpush1.bf16.msra.mxu0 %v3983_v30  ;;  %2630 = vmatpush1.bf16.msra.mxu1 %v3986_v31  ;;  %v1825_v30 = vrot.slane %v1820_v29, %v291_v16  ;;  %v1833_v31 = vrot.slane %v1820_v29, %v299_v17 }
 0x21c   :  { %2545 = vmatprep.subr.bf16.mxu0 %v3991_v32  ;;  %2631 = vmatprep.subr.bf16.mxu1 %v3994_v33  ;;  %v1829_v32 = vrot.slane %v1820_v29, %v295_v19  ;;  %v1837_v33 = vrot.slane %v1820_v29, %v303_v20 }
 0x21f   :  { %2546 = vmatpush1.bf16.msra.mxu0 %v3989_v34  ;;  %2632 = vmatpush1.bf16.msra.mxu1 %v3992_v35 }
 0x220   :  { %2547 = vmatprep.subr.bf16.mxu0 %v3997_v36  ;;  %2633 = vmatprep.subr.bf16.mxu1 %v4000_v37 }
 0x223   :  { %2548 = vmatpush1.bf16.msra.mxu0 %v3995_v38  ;;  %2634 = vmatpush1.bf16.msra.mxu1 %v3998_v39 }
 0x224   :  { %2549 = vmatprep.subr.bf16.mxu0 %v4003_v40  ;;  %2635 = vmatprep.subr.bf16.mxu1 %v4006_v41 }
 0x227   :  { %2550 = vmatpush1.bf16.msra.mxu0 %v4001_v42  ;;  %2636 = vmatpush1.bf16.msra.mxu1 %v4004_v43 }
 0x228   :  { %2551 = vmatprep.subr.bf16.mxu0 %v4009_v44  ;;  %2637 = vmatprep.subr.bf16.mxu1 %v4012_v45 }
 0x22b   :  { %2552 = vmatpush1.bf16.msra.mxu0 %v4007_v46  ;;  %2638 = vmatpush1.bf16.msra.mxu1 %v4010_v47 }
 0x22c   :  { %2553 = vmatprep.subr.bf16.mxu0 %v4015_v48  ;;  %2639 = vmatprep.subr.bf16.mxu1 %v4018_v49 }
 0x22f   :  { %2554 = vmatpush1.bf16.msra.mxu0 %v4013_v51  ;;  %2640 = vmatpush1.bf16.msra.mxu1 %v4016_v52 }
 0x230   :  { %2555 = vmatprep.subr.bf16.mxu0 %v4021_v53  ;;  %2641 = vmatprep.subr.bf16.mxu1 %v4024_v54 }
 0x233   :  { %2556 = vmatpush1.bf16.msra.mxu0 %v4019_v55  ;;  %2642 = vmatpush1.bf16.msra.mxu1 %v4022_v56 }
 0x234   :  { %3425 = vmatprep.subr.bf16.mxu0 %v4025_v57  ;;  %3447 = vmatprep.subr.bf16.mxu1 %v4026_v58 }
 0x236   :  { %2558 = vmatmul.mubr.bf16.vlgmr.msra.gmra.mrb[4].mxu0 %v4308_v50  ;;  %2644 = vmatmul.mubr.bf16.vlgmr.msra.gmra.mrb[4].mxu1 %v4308_v50  ;;  %v4040_v50 = vld [vmem:[#allocation10 + $0x98] sm:$0xff]  }
 0x237   :  { %3426 = vmatpush3.bf16.msra.mxu0 %v4027_v59  ;;  %3448 = vmatpush3.bf16.msra.mxu1 %v4028_v60  ;;  %v3383_v60 = vld [vmem:[%s4347_s6] ss:$0 sm:$0xff]  ;;  %s4145_s6 = scalar_lea.vmem %s3037_s9, 128 }
 0x238   :  { %3427 = vmatprep.subr.bf16.mxu0 %v4029_v61  ;;  %3449 = vmatprep.subr.bf16.mxu1 %v4030_v62  ;;  %p4146_p4 = scmp.ne.s32.totalorder %s3037_s9, %s4145_s6  ;;  %p4151_p6 = scmp.lt.s32.totalorder %s4145_s6, %s4145_s6 }
 0x23a   :  { %p4152_p7 = por %p4151_p6, %p4150_p5 }
 0x23b   :  { %3428 = vmatpush3.bf16.msra.mxu0 %v4031_v63  ;;  %3450 = vmatpush3.bf16.msra.mxu1 %v4032_v0 }
 0x23c   :  { %3429 = vmatprep.subr.bf16.mxu0 %v4033_v1  ;;  %3451 = vmatprep.subr.bf16.mxu1 %v4034_v2  ;;  %p4153_p8 = pnand %p4152_p7, %p4146_p4 }
 0x23f   :  { %3430 = vmatpush3.bf16.msra.mxu0 %v4035_v3  ;;  %3452 = vmatpush3.bf16.msra.mxu1 %v4036_v4 }
 0x240   :  { %3431 = vmatprep.subr.bf16.mxu0 %v4037_v5  ;;  %3453 = vmatprep.subr.bf16.mxu1 %v4038_v6 }
 0x243   :  { %3432 = vmatpush3.bf16.msra.mxu0 %v4039_v7  ;;  %3454 = vmatpush3.bf16.msra.mxu1 %v4040_v50 }
 0x244   :  { %3433 = vmatprep.subr.bf16.mxu0 %v4041_v8  ;;  %3455 = vmatprep.subr.bf16.mxu1 %v4042_v9 }
 0x247   :  { %3434 = vmatpush3.bf16.msra.mxu0 %v4043_v10  ;;  %3456 = vmatpush3.bf16.msra.mxu1 %v4044_v11 }
 0x248   :  { %3435 = vmatprep.subr.bf16.mxu0 %v4045_v12  ;;  %3457 = vmatprep.subr.bf16.mxu1 %v4046_v13 }
 0x24b   :  { %3436 = vmatpush3.bf16.msra.mxu0 %v4047_v14  ;;  %3458 = vmatpush3.bf16.msra.mxu1 %v4048_v18 }
 0x24c   :  { %3437 = vmatprep.subr.bf16.mxu0 %v4049_v21  ;;  %3459 = vmatprep.subr.bf16.mxu1 %v4050_v22 }
 0x24f   :  { %3438 = vmatpush3.bf16.msra.mxu0 %v4051_v23  ;;  %3460 = vmatpush3.bf16.msra.mxu1 %v4052_v24 }
 0x250   :  { %3439 = vmatprep.subr.bf16.mxu0 %v4053_v25  ;;  %3461 = vmatprep.subr.bf16.mxu1 %v4054_v26 }
 0x253   :  { %3440 = vmatpush3.bf16.msra.mxu0 %v4055_v27  ;;  %3462 = vmatpush3.bf16.msra.mxu1 %v4056_v28 }
 0x309   :  { %v2559_v34 = vpop.f32.mrb[4].mxu0  ;;  %v2645_v35 = vpop.f32.mrb[4].mxu1 }
 0x30a   :  { %v3477_v36 = vadd.f32 %v2559_v34, %v1825_v30  ;;  %v3481_v37 = vadd.f32 %v2645_v35, %v1833_v31  ;;  %v2561_v38 = vpop.f32.mrb[5].mxu0  ;;  %v2647_v39 = vpop.f32.mrb[5].mxu1 }
 0x30b   :  { %v3478_v40 = vadd.f32 %v2561_v38, %v1829_v32  ;;  %v3482_v41 = vadd.f32 %v2647_v39, %v1837_v33  ;;  %v2563_v42 = vpop.f32.mrb[6].mxu0  ;;  %v2649_v43 = vpop.f32.mrb[6].mxu1 }
 0x30c   :  { %v3479_v16 = vadd.f32 %v2563_v42, %v1825_v30  ;;  %v3483_v44 = vadd.f32 %v2649_v43, %v1833_v31  ;;  %v2565_v45 = vpop.f32.mrb[7].mxu0  ;;  %v2651_v17 = vpop.f32.mrb[7].mxu1  ;;  %v2654_v19 = vmax.f32 %v3477_v36, 0.0  ;;  %v2656_v48 = vmax.f32 %v3481_v37, 0.0 }
 0x30d   :  { %v3480_v46 = vadd.f32 %v2565_v45, %v1829_v32  ;;  %v3484_v47 = vadd.f32 %v2651_v17, %v1837_v33  ;;  %v2655_v49 = vmax.f32 %v3478_v40, 0.0  ;;  %v2657_v51 = vmax.f32 %v3482_v41, 0.0 }
 0x30e   :  { %v2658_v15 = vmax.f32 %v3479_v16, 0.0  ;;  %v2660_v20 = vmax.f32 %v3483_v44, 0.0 }
 0x30f   :  { %v2659_v52 = vmax.f32 %v3480_v46, 0.0  ;;  %v2661_v53 = vmax.f32 %v3484_v47, 0.0 }
 0x310   :  { %v2662_v54 = vpack.c.bf16 %v2658_v15, %v2654_v19  ;;  %v2664_v55 = vpack.c.bf16 %v2660_v20, %v2656_v48 }
 0x311   :  { %v2663_v56 = vpack.c.bf16 %v2659_v52, %v2655_v49  ;;  %v2665_v57 = vpack.c.bf16 %v2661_v53, %v2657_v51 }
 0x313   :  { %2969 = vmatprep.mubr.bf16.mxu0 %v2663_v56  ;;  %3010 = vmatprep.mubr.bf16.mxu1 %v2665_v57 }
 0x314   :  { %2970 = vmatmul.mubr.bf16.vlgmr.msra.gmra.mrb[8].mxu0 %v2662_v54  ;;  %3011 = vmatmul.mubr.bf16.vlgmr.msra.gmra.mrb[8].mxu1 %v2664_v55 }
 0x3e7   :  { %v3441_v58 = vpop.f32.mrb[8].mxu0  ;;  %v3463_v59 = vpop.f32.mrb[8].mxu1 }
 0x3e8   :  { %v3442_v61 = vpop.f32.mrb[9].mxu0  ;;  %v3464_v62 = vpop.f32.mrb[9].mxu1 }
 0x3e9   :  { %v3443_v63 = vadd.f32 %v3442_v61, %v3441_v58  ;;  %v3465_v0 = vadd.f32 %v3464_v62, %v3463_v59  ;;  %v3444_v1 = vpop.f32.mrb[10].mxu0  ;;  %v3466_v2 = vpop.f32.mrb[10].mxu1 }
 0x3ea   :  { %v3445_v3 = vpop.f32.mrb[11].mxu0  ;;  %v3467_v4 = vpop.f32.mrb[11].mxu1 }
 0x3eb   :  { %v2972_v5 = vadd.f32 %v3443_v63, %v3383_v60  ;;  %v3446_v6 = vadd.f32 %v3445_v3, %v3444_v1  ;;  %v3468_v7 = vadd.f32 %v3467_v4, %v3466_v2 }
 0x3ed   :  { %v3013_v50 = vadd.f32 %v3465_v0, %v2972_v5  ;;  %v2975_v8 = vadd.f32 %v3446_v6, %v3383_v60 }
 0x3ef   :  { %v3016_v9 = vadd.f32 %v3468_v7, %v2975_v8  ;;  %v3019_v10 = vmax.f32 %v3013_v50, 0.0 }
 0x3f1   :  { %v3020_v11 = vmax.f32 %v3016_v9, 0.0 }
 0x3f3   :  { %v3423_v12 = vpack.c.bf16 %v3020_v11, %v3019_v10 }
 0x3f5   :  { %3424 = vst [vmem:[#allocation12] sm:$0xff] %v3423_v12  }
 0x3f6   :  { %4156 = shalt.err (!%p4153_p8)
}
 0x3f7   :  { %s4157_s14 = scalar_lea.hbm %s4348_s7, 128 }
 0x3f8   :  { %p4158_p9 = scmp.ne.s32.totalorder %s4348_s7, %s4157_s14  ;;  %p4161_p10 = scmp.lt.u32.totalorder %s4157_s14, %s4348_s7 }
 0x3fa   :  { %p4163_p11 = pnand %p4161_p10, %p4158_p9 }
 0x3fc   :  { %4166 = shalt.err (!%p4163_p11)
}
 0x3fd   :  { %3042 = dma.vmem_to_hbm [thread:$0]  %s3037_s9, 128, %s4348_s7, [#allocation6], %s4183_s3, %s4183_s3, %s4184_s11  }
 0x3fe   :  { %4173 = dma.done.wait [#allocation6], 128  }
 0x3ff   :  { %4174 = vsyncadd [#allocation6], 4294967168 }
 0x400   :  { %3046 = vsyncpa [#allocation5], 1 }
 0x401   :  { %3047 = vsyncpa [#allocation8], 1 }
 0x402   :  { %3048 = vsyncpa [#allocation11], 1 }
 0x403   :  { %3049 = vsyncpa [#allocation6], 1 }

</bundles_post_ra>
